<compile_context>
chip_gen: v7x
topology: tpu7x:2x2x1
jax: 0.10.0
libtpu: 0.0.40
codegen_flags: <defaults>
</compile_context>

<pallas_src>
import functools

import jax
import jax.numpy as jnp
from jax.experimental import pallas as pl
from jax.experimental.pallas import tpu as pltpu


def lstm_conv_kernel(x_ref, w_ih_ref, w_hh_ref, b_ref, wfc_ref, bfc_ref,
                     out_ref, seq_ref, xw_ref, *, batch_pad, seq_len):
    """Stacked-LSTM recurrence + 1x1-conv head.

    x_ref    : [T*Bp, A]  bf16  time-major, batch padded to Bp (pad rows = 0)
    w_ih_ref : [L, A, 4A] bf16  fused input->gate weights, order (i, f, o, g)
    w_hh_ref : [L, A, 4A] bf16  fused hidden->gate weights, same order
    b_ref    : [L, 1, 4A] f32   combined bias (b_ih + b_hh)
    wfc_ref  : [F, T]     f32   SMEM 1x1-conv weight (scalar table)
    bfc_ref  : [F, 1]     f32   SMEM 1x1-conv bias
    out_ref  : [F*Bp, A]  f32   row f*Bp + b holds prediction[b, f, :]
    seq_ref  : [T*Bp, A]  f32   VMEM scratch: current layer's hidden sequence
    xw_ref   : [T*Bp, 4A] f32   VMEM scratch: staged input projection
    """
    Bp, T = batch_pad, seq_len
    A = x_ref.shape[1]
    L = w_ih_ref.shape[0]
    F = wfc_ref.shape[0]
    A3 = 3 * A

    for l in range(L):
        # Hoisted input projection (+ combined bias): one matmul per layer,
        # bf16 operands / f32 accumulation, staged into a VMEM scratch so the
        # unrolled time loop reads aligned [Bp, 4A] slices instead of slicing
        # a live value.
        layer_in = x_ref[...] if l == 0 else seq_ref[...].astype(jnp.bfloat16)
        xw_ref[...] = (jnp.dot(layer_in, w_ih_ref[l],
                               preferred_element_type=jnp.float32)
                       + b_ref[l])                                 # [T*Bp,4A]

        w_hh = w_hh_ref[l]                                         # [A,4A] bf16

        h = jnp.zeros((Bp, A), jnp.float32)
        c = jnp.zeros((Bp, A), jnp.float32)
        # T*L = 16 serial steps: full static unroll (use lax.fori_loop with an
        # (h, c) carry for large T).
        for t in range(T):
            gates = xw_ref[pl.ds(t * Bp, Bp), :] + jnp.dot(
                h.astype(jnp.bfloat16), w_hh,
                preferred_element_type=jnp.float32)                # [Bp,4A] f32
            # sigmoid(x) = 0.5*tanh(0.5*x)+0.5 : one EUP push for the whole
            # (i, f, o) slab; gate/state math stays f32 (v5e-safe).
            ifo = 0.5 * jnp.tanh(0.5 * gates[:, :A3]) + 0.5
            g_g = jnp.tanh(gates[:, A3:])
            i_g = ifo[:, :A]
            f_g = ifo[:, A:2 * A]
            o_g = ifo[:, 2 * A:]
            c = f_g * c + i_g * g_g
            h = o_g * jnp.tanh(c)
            # Aligned 8-sublane tile store (t*Bp is a static multiple of 8).
            seq_ref[pl.ds(t * Bp, Bp), :] = h

    # 1x1-conv head, exact 'ft,tba->fba' contraction without the Kronecker
    # expansion: F*T scalar-broadcast FMAs on aligned [Bp, A] tiles. Pad rows
    # carry finite garbage and are dropped by the wrapper.
    acc = [jnp.zeros((Bp, A), jnp.float32) for _ in range(F)]
    for t in range(T):
        tile = seq_ref[pl.ds(t * Bp, Bp), :]
        for f in range(F):
            acc[f] = acc[f] + wfc_ref[f, t] * tile
    for f in range(F):
        out_ref[pl.ds(f * Bp, Bp), :] = acc[f] + bfc_ref[f, 0]


def _fuse_params(w_ih, w_hh, b):
    """Re-layout PyTorch-style params (one-time weight prep).

    Gate order changes from PyTorch's (i, f, g, o) to (i, f, o, g) so the
    three sigmoid gates occupy one contiguous [*, 3A] slab. MXU weights are
    stored as bf16 (f32 accumulation in-kernel); the combined bias stays f32.
    """
    order = (0, 1, 3, 2)
    w_ih_all = jnp.concatenate([w_ih[:, g] for g in order],
                               axis=-1).astype(jnp.bfloat16)      # [L,A,4A]
    w_hh_all = jnp.concatenate([w_hh[:, g] for g in order],
                               axis=-1).astype(jnp.bfloat16)      # [L,A,4A]
    b_all = jnp.concatenate([b[:, g] for g in order], axis=-1)    # [L,1,4A] f32
    return w_ih_all, w_hh_all, b_all


@jax.jit
def lstm_model_forward(x, w_ih, w_hh, b, wfc, bfc):
    """x: [B, T, A] (batch_first).  Returns prediction [B, F, A]."""
    B, T, A = x.shape
    F = wfc.shape[0]
    B_pad = ((B + 7) // 8) * 8          # sublane-aligned batch rows

    w_ih_all, w_hh_all, b_all = _fuse_params(w_ih, w_hh, b)

    # Time-major layout, batch padded to B_pad with ZERO rows (keeps every
    # scratch row defined/finite; pad predictions are sliced away below).
    x_tm = jnp.transpose(x, (1, 0, 2))                            # [T, B, A]
    x_pad = jnp.zeros((T, B_pad, A), x.dtype).at[:, :B, :].set(x_tm)
    x_flat = x_pad.reshape(T * B_pad, A).astype(jnp.bfloat16)     # MXU LHS bf16

    kernel = functools.partial(lstm_conv_kernel, batch_pad=B_pad, seq_len=T)
    out_flat = pl.pallas_call(
        kernel,
        out_shape=jax.ShapeDtypeStruct((F * B_pad, A), jnp.float32),
        in_specs=[
            pl.BlockSpec(memory_space=pltpu.MemorySpace.VMEM),    # x
            pl.BlockSpec(memory_space=pltpu.MemorySpace.VMEM),    # w_ih
            pl.BlockSpec(memory_space=pltpu.MemorySpace.VMEM),    # w_hh
            pl.BlockSpec(memory_space=pltpu.MemorySpace.VMEM),    # bias
            pl.BlockSpec(memory_space=pltpu.MemorySpace.SMEM),    # wfc (scalars)
            pl.BlockSpec(memory_space=pltpu.MemorySpace.SMEM),    # bfc (scalars)
        ],
        out_specs=pl.BlockSpec(memory_space=pltpu.MemorySpace.VMEM),
        scratch_shapes=[
            pltpu.VMEM((T * B_pad, A), jnp.float32),      # hidden sequence
            pltpu.VMEM((T * B_pad, 4 * A), jnp.float32),  # staged x @ W_ih + b
        ],
        # Gridless: the recurrence is strictly serial and everything is a few
        # KB of VMEM at these shapes. For large B on v7x, add a grid over
        # batch blocks with dimension_semantics=("parallel",) (2 TensorCores)
        # and set CompilerParams(vmem_limit_bytes=...) against 64 MiB.
    )(x_flat, w_ih_all, w_hh_all, b_all, wfc, bfc)

    # [F*B_pad, A] -> [F, B_pad, A] -> drop pad rows -> [B, F, A]
    return jnp.transpose(out_flat.reshape(F, B_pad, A)[:, :B, :], (1, 0, 2))


def reference_forward(x, w_ih, w_hh, b, wfc, bfc):
    """Pure-f32 JAX reference mirroring torch.nn.LSTM(batch_first)+Conv2d(1x1)."""
    B, T, A = x.shape
    L = w_ih.shape[0]
    seq = x.astype(jnp.float32)
    for l in range(L):
        h = jnp.zeros((B, A), jnp.float32)
        c = jnp.zeros((B, A), jnp.float32)
        outs = []
        for t in range(T):
            xt = seq[:, t, :]
            gates = [xt @ w_ih[l, g] + h @ w_hh[l, g] + b[l, g] for g in range(4)]
            i_g = jax.nn.sigmoid(gates[0])
            f_g = jax.nn.sigmoid(gates[1])
            g_g = jnp.tanh(gates[2])
            o_g = jax.nn.sigmoid(gates[3])
            c = f_g * c + i_g * g_g
            h = o_g * jnp.tanh(c)
            outs.append(h)
        seq = jnp.stack(outs, axis=1)
    out = jnp.einsum('ft,bta->bfa', wfc, seq) + bfc[None, :, :]
    return out


if __name__ == "__main__":
    # Small, forward-consistent shapes:
    #   batch=2, past_seq=8, num_assets=8, future_seq=4, num_layers=2
    B, T, A, F, L = 2, 8, 8, 4, 2

    key = jax.random.PRNGKey(0)
    ks = jax.random.split(key, 6)
    s_lstm = 1.0 / float(A) ** 0.5   # PyTorch LSTM init range
    s_fc = 1.0 / float(T) ** 0.5     # Conv2d fan_in = past_seq * 1 * 1

    x = jax.random.normal(ks[0], (B, T, A), jnp.float32)
    # Per-gate weights stored as [A_in, A_hidden], PyTorch gate order (i,f,g,o).
    w_ih = jax.random.uniform(ks[1], (L, 4, A, A), jnp.float32, -s_lstm, s_lstm)
    w_hh = jax.random.uniform(ks[2], (L, 4, A, A), jnp.float32, -s_lstm, s_lstm)
    b = jax.random.uniform(ks[3], (L, 4, 1, A), jnp.float32, -s_lstm, s_lstm)
    wfc = jax.random.uniform(ks[4], (F, T), jnp.float32, -s_fc, s_fc)
    bfc = jax.random.uniform(ks[5], (F, 1), jnp.float32, -s_fc, s_fc)

    out = lstm_model_forward(x, w_ih, w_hh, b, wfc, bfc)
    out = jax.block_until_ready(out)

    ref = reference_forward(x, w_ih, w_hh, b, wfc, bfc)
    assert out.shape == (B, F, A)
    # bf16 MXU operands (f32 accumulation / f32 state) drift from the pure-f32
    # reference by ~1e-2 over the T*L recurrence; tolerance loosened per review.
    assert jnp.allclose(out, ref, atol=5e-2, rtol=5e-2), "mismatch vs JAX reference"

    print("KERNEL_OK")
</pallas_src>

<mosaic_0001>
module attributes {stable_mosaic.version = 11 : i64} {
  func.func @lstm_conv_kernel(%arg0: memref<64x8xbf16, #tpu.memory_space<vmem>>, %arg1: memref<2x8x32xbf16, #tpu.memory_space<vmem>>, %arg2: memref<2x8x32xbf16, #tpu.memory_space<vmem>>, %arg3: memref<2x1x32xf32, #tpu.memory_space<vmem>>, %arg4: memref<4x8xf32, #tpu.memory_space<smem>>, %arg5: memref<4x1xf32, #tpu.memory_space<smem>>, %arg6: memref<32x8xf32, #tpu.memory_space<vmem>>, %arg7: memref<64x8xf32, #tpu.memory_space<vmem>>, %arg8: memref<64x32xf32, #tpu.memory_space<vmem>>) attributes {dimension_semantics = [], scalar_prefetch = 0 : i64, scratch_operands = 2 : i64, tpu.core_type = #tpu.core_type<tc>} {
    %c0 = arith.constant 0 : index
    %c0_0 = arith.constant 0 : index
    %0 = vector.load %arg0[%c0, %c0_0] : memref<64x8xbf16, #tpu.memory_space<vmem>>, vector<64x8xbf16>
    %c0_1 = arith.constant 0 : index
    %c0_2 = arith.constant 0 : index
    %c0_3 = arith.constant 0 : index
    %1 = vector.load %arg1[%c0_1, %c0_2, %c0_3] : memref<2x8x32xbf16, #tpu.memory_space<vmem>>, vector<1x8x32xbf16>
    %2 = vector.shape_cast %1 : vector<1x8x32xbf16> to vector<8x32xbf16>
    %cst = arith.constant dense<0.000000e+00> : vector<64x32xf32>
    %3 = tpu.matmul %0, %2, %cst {dimension_numbers = #tpu.dot_dimension_numbers<[1], [0], [0], [1], [0, 0, 1, 1], [], []>} : vector<64x8xbf16>, vector<8x32xbf16>, vector<64x32xf32> -> vector<64x32xf32>
    %c0_4 = arith.constant 0 : index
    %c0_5 = arith.constant 0 : index
    %c0_6 = arith.constant 0 : index
    %4 = vector.load %arg3[%c0_4, %c0_5, %c0_6] : memref<2x1x32xf32, #tpu.memory_space<vmem>>, vector<1x1x32xf32>
    %5 = vector.shape_cast %4 : vector<1x1x32xf32> to vector<1x32xf32>
    %6 = vector.broadcast %5 : vector<1x32xf32> to vector<64x32xf32>
    %7 = arith.addf %3, %6 : vector<64x32xf32>
    %c0_7 = arith.constant 0 : index
    %c0_8 = arith.constant 0 : index
    %8 = vector.load %arg8[%c0_7, %c0_8] : memref<64x32xf32, #tpu.memory_space<vmem>>, vector<64x32xf32>
    tpu.vector_store %arg8[%c0_7, %c0_8], %7 {strides = array<i32>} : memref<64x32xf32, #tpu.memory_space<vmem>>, vector<64x32xf32>,
    %c0_9 = arith.constant 0 : index
    %c0_10 = arith.constant 0 : index
    %c0_11 = arith.constant 0 : index
    %9 = vector.load %arg2[%c0_9, %c0_10, %c0_11] : memref<2x8x32xbf16, #tpu.memory_space<vmem>>, vector<1x8x32xbf16>
    %10 = vector.shape_cast %9 : vector<1x8x32xbf16> to vector<8x32xbf16>
    %cst_12 = arith.constant 0.000000e+00 : f32
    %11 = vector.broadcast %cst_12 : f32 to vector<8x8xf32>
    %cst_13 = arith.constant 0.000000e+00 : f32
    %12 = vector.broadcast %cst_13 : f32 to vector<8x8xf32>
    %c0_14 = arith.constant 0 : index
    %c0_15 = arith.constant 0 : index
    %13 = vector.load %arg8[%c0_14, %c0_15] : memref<64x32xf32, #tpu.memory_space<vmem>>, vector<8x32xf32>
    %14 = arith.truncf %11 : vector<8x8xf32> to vector<8x8xbf16>
    %cst_16 = arith.constant dense<0.000000e+00> : vector<8x32xf32>
    %15 = tpu.matmul %14, %10, %cst_16 {dimension_numbers = #tpu.dot_dimension_numbers<[1], [0], [0], [1], [0, 0, 1, 1], [], []>} : vector<8x8xbf16>, vector<8x32xbf16>, vector<8x32xf32> -> vector<8x32xf32>
    %16 = arith.addf %13, %15 : vector<8x32xf32>
    %17 = vector.extract_strided_slice %16 {offsets = [0, 0], sizes = [8, 24], strides = [1, 1]} : vector<8x32xf32> to vector<8x24xf32>
    %cst_17 = arith.constant 5.000000e-01 : f32
    %18 = vector.broadcast %cst_17 : f32 to vector<8x24xf32>
    %19 = arith.mulf %18, %17 : vector<8x24xf32>
    %20 = math.tanh %19 : vector<8x24xf32>
    %cst_18 = arith.constant 5.000000e-01 : f32
    %21 = vector.broadcast %cst_18 : f32 to vector<8x24xf32>
    %22 = arith.mulf %21, %20 : vector<8x24xf32>
    %cst_19 = arith.constant 5.000000e-01 : f32
    %23 = vector.broadcast %cst_19 : f32 to vector<8x24xf32>
    %24 = arith.addf %22, %23 : vector<8x24xf32>
    %25 = vector.extract_strided_slice %16 {offsets = [0, 24], sizes = [8, 8], strides = [1, 1]} : vector<8x32xf32> to vector<8x8xf32>
    %26 = math.tanh %25 : vector<8x8xf32>
    %27 = vector.extract_strided_slice %24 {offsets = [0, 0], sizes = [8, 8], strides = [1, 1]} : vector<8x24xf32> to vector<8x8xf32>
    %28 = vector.extract_strided_slice %24 {offsets = [0, 8], sizes = [8, 8], strides = [1, 1]} : vector<8x24xf32> to vector<8x8xf32>
    %29 = vector.extract_strided_slice %24 {offsets = [0, 16], sizes = [8, 8], strides = [1, 1]} : vector<8x24xf32> to vector<8x8xf32>
    %30 = arith.mulf %28, %12 : vector<8x8xf32>
    %31 = arith.mulf %27, %26 : vector<8x8xf32>
    %32 = arith.addf %30, %31 : vector<8x8xf32>
    %33 = math.tanh %32 : vector<8x8xf32>
    %34 = arith.mulf %29, %33 : vector<8x8xf32>
    %c0_20 = arith.constant 0 : index
    %c0_21 = arith.constant 0 : index
    %35 = vector.load %arg7[%c0_20, %c0_21] : memref<64x8xf32, #tpu.memory_space<vmem>>, vector<8x8xf32>
    tpu.vector_store %arg7[%c0_20, %c0_21], %34 {strides = array<i32>} : memref<64x8xf32, #tpu.memory_space<vmem>>, vector<8x8xf32>,
    %c8 = arith.constant 8 : index
    %c0_22 = arith.constant 0 : index
    %36 = vector.load %arg8[%c8, %c0_22] : memref<64x32xf32, #tpu.memory_space<vmem>>, vector<8x32xf32>
    %37 = arith.truncf %34 : vector<8x8xf32> to vector<8x8xbf16>
    %cst_23 = arith.constant dense<0.000000e+00> : vector<8x32xf32>
    %38 = tpu.matmul %37, %10, %cst_23 {dimension_numbers = #tpu.dot_dimension_numbers<[1], [0], [0], [1], [0, 0, 1, 1], [], []>} : vector<8x8xbf16>, vector<8x32xbf16>, vector<8x32xf32> -> vector<8x32xf32>
    %39 = arith.addf %36, %38 : vector<8x32xf32>
    %40 = vector.extract_strided_slice %39 {offsets = [0, 0], sizes = [8, 24], strides = [1, 1]} : vector<8x32xf32> to vector<8x24xf32>
    %cst_24 = arith.constant 5.000000e-01 : f32
    %41 = vector.broadcast %cst_24 : f32 to vector<8x24xf32>
    %42 = arith.mulf %41, %40 : vector<8x24xf32>
    %43 = math.tanh %42 : vector<8x24xf32>
    %cst_25 = arith.constant 5.000000e-01 : f32
    %44 = vector.broadcast %cst_25 : f32 to vector<8x24xf32>
    %45 = arith.mulf %44, %43 : vector<8x24xf32>
    %cst_26 = arith.constant 5.000000e-01 : f32
    %46 = vector.broadcast %cst_26 : f32 to vector<8x24xf32>
    %47 = arith.addf %45, %46 : vector<8x24xf32>
    %48 = vector.extract_strided_slice %39 {offsets = [0, 24], sizes = [8, 8], strides = [1, 1]} : vector<8x32xf32> to vector<8x8xf32>
    %49 = math.tanh %48 : vector<8x8xf32>
    %50 = vector.extract_strided_slice %47 {offsets = [0, 0], sizes = [8, 8], strides = [1, 1]} : vector<8x24xf32> to vector<8x8xf32>
    %51 = vector.extract_strided_slice %47 {offsets = [0, 8], sizes = [8, 8], strides = [1, 1]} : vector<8x24xf32> to vector<8x8xf32>
    %52 = vector.extract_strided_slice %47 {offsets = [0, 16], sizes = [8, 8], strides = [1, 1]} : vector<8x24xf32> to vector<8x8xf32>
    %53 = arith.mulf %51, %32 : vector<8x8xf32>
    %54 = arith.mulf %50, %49 : vector<8x8xf32>
    %55 = arith.addf %53, %54 : vector<8x8xf32>
    %56 = math.tanh %55 : vector<8x8xf32>
    %57 = arith.mulf %52, %56 : vector<8x8xf32>
    %c8_27 = arith.constant 8 : index
    %c0_28 = arith.constant 0 : index
    %58 = vector.load %arg7[%c8_27, %c0_28] : memref<64x8xf32, #tpu.memory_space<vmem>>, vector<8x8xf32>
    tpu.vector_store %arg7[%c8_27, %c0_28], %57 {strides = array<i32>} : memref<64x8xf32, #tpu.memory_space<vmem>>, vector<8x8xf32>,
    %c16 = arith.constant 16 : index
    %c0_29 = arith.constant 0 : index
    %59 = vector.load %arg8[%c16, %c0_29] : memref<64x32xf32, #tpu.memory_space<vmem>>, vector<8x32xf32>
    %60 = arith.truncf %57 : vector<8x8xf32> to vector<8x8xbf16>
    %cst_30 = arith.constant dense<0.000000e+00> : vector<8x32xf32>
    %61 = tpu.matmul %60, %10, %cst_30 {dimension_numbers = #tpu.dot_dimension_numbers<[1], [0], [0], [1], [0, 0, 1, 1], [], []>} : vector<8x8xbf16>, vector<8x32xbf16>, vector<8x32xf32> -> vector<8x32xf32>
    %62 = arith.addf %59, %61 : vector<8x32xf32>
    %63 = vector.extract_strided_slice %62 {offsets = [0, 0], sizes = [8, 24], strides = [1, 1]} : vector<8x32xf32> to vector<8x24xf32>
    %cst_31 = arith.constant 5.000000e-01 : f32
    %64 = vector.broadcast %cst_31 : f32 to vector<8x24xf32>
    %65 = arith.mulf %64, %63 : vector<8x24xf32>
    %66 = math.tanh %65 : vector<8x24xf32>
    %cst_32 = arith.constant 5.000000e-01 : f32
    %67 = vector.broadcast %cst_32 : f32 to vector<8x24xf32>
    %68 = arith.mulf %67, %66 : vector<8x24xf32>
    %cst_33 = arith.constant 5.000000e-01 : f32
    %69 = vector.broadcast %cst_33 : f32 to vector<8x24xf32>
    %70 = arith.addf %68, %69 : vector<8x24xf32>
    %71 = vector.extract_strided_slice %62 {offsets = [0, 24], sizes = [8, 8], strides = [1, 1]} : vector<8x32xf32> to vector<8x8xf32>
    %72 = math.tanh %71 : vector<8x8xf32>
    %73 = vector.extract_strided_slice %70 {offsets = [0, 0], sizes = [8, 8], strides = [1, 1]} : vector<8x24xf32> to vector<8x8xf32>
    %74 = vector.extract_strided_slice %70 {offsets = [0, 8], sizes = [8, 8], strides = [1, 1]} : vector<8x24xf32> to vector<8x8xf32>
    %75 = vector.extract_strided_slice %70 {offsets = [0, 16], sizes = [8, 8], strides = [1, 1]} : vector<8x24xf32> to vector<8x8xf32>
    %76 = arith.mulf %74, %55 : vector<8x8xf32>
    %77 = arith.mulf %73, %72 : vector<8x8xf32>
    %78 = arith.addf %76, %77 : vector<8x8xf32>
    %79 = math.tanh %78 : vector<8x8xf32>
    %80 = arith.mulf %75, %79 : vector<8x8xf32>
    %c16_34 = arith.constant 16 : index
    %c0_35 = arith.constant 0 : index
    %81 = vector.load %arg7[%c16_34, %c0_35] : memref<64x8xf32, #tpu.memory_space<vmem>>, vector<8x8xf32>
    tpu.vector_store %arg7[%c16_34, %c0_35], %80 {strides = array<i32>} : memref<64x8xf32, #tpu.memory_space<vmem>>, vector<8x8xf32>,
    %c24 = arith.constant 24 : index
    %c0_36 = arith.constant 0 : index
    %82 = vector.load %arg8[%c24, %c0_36] : memref<64x32xf32, #tpu.memory_space<vmem>>, vector<8x32xf32>
    %83 = arith.truncf %80 : vector<8x8xf32> to vector<8x8xbf16>
    %cst_37 = arith.constant dense<0.000000e+00> : vector<8x32xf32>
    %84 = tpu.matmul %83, %10, %cst_37 {dimension_numbers = #tpu.dot_dimension_numbers<[1], [0], [0], [1], [0, 0, 1, 1], [], []>} : vector<8x8xbf16>, vector<8x32xbf16>, vector<8x32xf32> -> vector<8x32xf32>
    %85 = arith.addf %82, %84 : vector<8x32xf32>
    %86 = vector.extract_strided_slice %85 {offsets = [0, 0], sizes = [8, 24], strides = [1, 1]} : vector<8x32xf32> to vector<8x24xf32>
    %cst_38 = arith.constant 5.000000e-01 : f32
    %87 = vector.broadcast %cst_38 : f32 to vector<8x24xf32>
    %88 = arith.mulf %87, %86 : vector<8x24xf32>
    %89 = math.tanh %88 : vector<8x24xf32>
    %cst_39 = arith.constant 5.000000e-01 : f32
    %90 = vector.broadcast %cst_39 : f32 to vector<8x24xf32>
    %91 = arith.mulf %90, %89 : vector<8x24xf32>
    %cst_40 = arith.constant 5.000000e-01 : f32
    %92 = vector.broadcast %cst_40 : f32 to vector<8x24xf32>
    %93 = arith.addf %91, %92 : vector<8x24xf32>
    %94 = vector.extract_strided_slice %85 {offsets = [0, 24], sizes = [8, 8], strides = [1, 1]} : vector<8x32xf32> to vector<8x8xf32>
    %95 = math.tanh %94 : vector<8x8xf32>
    %96 = vector.extract_strided_slice %93 {offsets = [0, 0], sizes = [8, 8], strides = [1, 1]} : vector<8x24xf32> to vector<8x8xf32>
    %97 = vector.extract_strided_slice %93 {offsets = [0, 8], sizes = [8, 8], strides = [1, 1]} : vector<8x24xf32> to vector<8x8xf32>
    %98 = vector.extract_strided_slice %93 {offsets = [0, 16], sizes = [8, 8], strides = [1, 1]} : vector<8x24xf32> to vector<8x8xf32>
    %99 = arith.mulf %97, %78 : vector<8x8xf32>
    %100 = arith.mulf %96, %95 : vector<8x8xf32>
    %101 = arith.addf %99, %100 : vector<8x8xf32>
    %102 = math.tanh %101 : vector<8x8xf32>
    %103 = arith.mulf %98, %102 : vector<8x8xf32>
    %c24_41 = arith.constant 24 : index
    %c0_42 = arith.constant 0 : index
    %104 = vector.load %arg7[%c24_41, %c0_42] : memref<64x8xf32, #tpu.memory_space<vmem>>, vector<8x8xf32>
    tpu.vector_store %arg7[%c24_41, %c0_42], %103 {strides = array<i32>} : memref<64x8xf32, #tpu.memory_space<vmem>>, vector<8x8xf32>,
    %c32 = arith.constant 32 : index
    %c0_43 = arith.constant 0 : index
    %105 = vector.load %arg8[%c32, %c0_43] : memref<64x32xf32, #tpu.memory_space<vmem>>, vector<8x32xf32>
    %106 = arith.truncf %103 : vector<8x8xf32> to vector<8x8xbf16>
    %cst_44 = arith.constant dense<0.000000e+00> : vector<8x32xf32>
    %107 = tpu.matmul %106, %10, %cst_44 {dimension_numbers = #tpu.dot_dimension_numbers<[1], [0], [0], [1], [0, 0, 1, 1], [], []>} : vector<8x8xbf16>, vector<8x32xbf16>, vector<8x32xf32> -> vector<8x32xf32>
    %108 = arith.addf %105, %107 : vector<8x32xf32>
    %109 = vector.extract_strided_slice %108 {offsets = [0, 0], sizes = [8, 24], strides = [1, 1]} : vector<8x32xf32> to vector<8x24xf32>
    %cst_45 = arith.constant 5.000000e-01 : f32
    %110 = vector.broadcast %cst_45 : f32 to vector<8x24xf32>
    %111 = arith.mulf %110, %109 : vector<8x24xf32>
    %112 = math.tanh %111 : vector<8x24xf32>
    %cst_46 = arith.constant 5.000000e-01 : f32
    %113 = vector.broadcast %cst_46 : f32 to vector<8x24xf32>
    %114 = arith.mulf %113, %112 : vector<8x24xf32>
    %cst_47 = arith.constant 5.000000e-01 : f32
    %115 = vector.broadcast %cst_47 : f32 to vector<8x24xf32>
    %116 = arith.addf %114, %115 : vector<8x24xf32>
    %117 = vector.extract_strided_slice %108 {offsets = [0, 24], sizes = [8, 8], strides = [1, 1]} : vector<8x32xf32> to vector<8x8xf32>
    %118 = math.tanh %117 : vector<8x8xf32>
    %119 = vector.extract_strided_slice %116 {offsets = [0, 0], sizes = [8, 8], strides = [1, 1]} : vector<8x24xf32> to vector<8x8xf32>
    %120 = vector.extract_strided_slice %116 {offsets = [0, 8], sizes = [8, 8], strides = [1, 1]} : vector<8x24xf32> to vector<8x8xf32>
    %121 = vector.extract_strided_slice %116 {offsets = [0, 16], sizes = [8, 8], strides = [1, 1]} : vector<8x24xf32> to vector<8x8xf32>
    %122 = arith.mulf %120, %101 : vector<8x8xf32>
    %123 = arith.mulf %119, %118 : vector<8x8xf32>
    %124 = arith.addf %122, %123 : vector<8x8xf32>
    %125 = math.tanh %124 : vector<8x8xf32>
    %126 = arith.mulf %121, %125 : vector<8x8xf32>
    %c32_48 = arith.constant 32 : index
    %c0_49 = arith.constant 0 : index
    %127 = vector.load %arg7[%c32_48, %c0_49] : memref<64x8xf32, #tpu.memory_space<vmem>>, vector<8x8xf32>
    tpu.vector_store %arg7[%c32_48, %c0_49], %126 {strides = array<i32>} : memref<64x8xf32, #tpu.memory_space<vmem>>, vector<8x8xf32>,
    %c40 = arith.constant 40 : index
    %c0_50 = arith.constant 0 : index
    %128 = vector.load %arg8[%c40, %c0_50] : memref<64x32xf32, #tpu.memory_space<vmem>>, vector<8x32xf32>
    %129 = arith.truncf %126 : vector<8x8xf32> to vector<8x8xbf16>
    %cst_51 = arith.constant dense<0.000000e+00> : vector<8x32xf32>
    %130 = tpu.matmul %129, %10, %cst_51 {dimension_numbers = #tpu.dot_dimension_numbers<[1], [0], [0], [1], [0, 0, 1, 1], [], []>} : vector<8x8xbf16>, vector<8x32xbf16>, vector<8x32xf32> -> vector<8x32xf32>
    %131 = arith.addf %128, %130 : vector<8x32xf32>
    %132 = vector.extract_strided_slice %131 {offsets = [0, 0], sizes = [8, 24], strides = [1, 1]} : vector<8x32xf32> to vector<8x24xf32>
    %cst_52 = arith.constant 5.000000e-01 : f32
    %133 = vector.broadcast %cst_52 : f32 to vector<8x24xf32>
    %134 = arith.mulf %133, %132 : vector<8x24xf32>
    %135 = math.tanh %134 : vector<8x24xf32>
    %cst_53 = arith.constant 5.000000e-01 : f32
    %136 = vector.broadcast %cst_53 : f32 to vector<8x24xf32>
    %137 = arith.mulf %136, %135 : vector<8x24xf32>
    %cst_54 = arith.constant 5.000000e-01 : f32
    %138 = vector.broadcast %cst_54 : f32 to vector<8x24xf32>
    %139 = arith.addf %137, %138 : vector<8x24xf32>
    %140 = vector.extract_strided_slice %131 {offsets = [0, 24], sizes = [8, 8], strides = [1, 1]} : vector<8x32xf32> to vector<8x8xf32>
    %141 = math.tanh %140 : vector<8x8xf32>
    %142 = vector.extract_strided_slice %139 {offsets = [0, 0], sizes = [8, 8], strides = [1, 1]} : vector<8x24xf32> to vector<8x8xf32>
    %143 = vector.extract_strided_slice %139 {offsets = [0, 8], sizes = [8, 8], strides = [1, 1]} : vector<8x24xf32> to vector<8x8xf32>
    %144 = vector.extract_strided_slice %139 {offsets = [0, 16], sizes = [8, 8], strides = [1, 1]} : vector<8x24xf32> to vector<8x8xf32>
    %145 = arith.mulf %143, %124 : vector<8x8xf32>
    %146 = arith.mulf %142, %141 : vector<8x8xf32>
    %147 = arith.addf %145, %146 : vector<8x8xf32>
    %148 = math.tanh %147 : vector<8x8xf32>
    %149 = arith.mulf %144, %148 : vector<8x8xf32>
    %c40_55 = arith.constant 40 : index
    %c0_56 = arith.constant 0 : index
    %150 = vector.load %arg7[%c40_55, %c0_56] : memref<64x8xf32, #tpu.memory_space<vmem>>, vector<8x8xf32>
    tpu.vector_store %arg7[%c40_55, %c0_56], %149 {strides = array<i32>} : memref<64x8xf32, #tpu.memory_space<vmem>>, vector<8x8xf32>,
    %c48 = arith.constant 48 : index
    %c0_57 = arith.constant 0 : index
    %151 = vector.load %arg8[%c48, %c0_57] : memref<64x32xf32, #tpu.memory_space<vmem>>, vector<8x32xf32>
    %152 = arith.truncf %149 : vector<8x8xf32> to vector<8x8xbf16>
    %cst_58 = arith.constant dense<0.000000e+00> : vector<8x32xf32>
    %153 = tpu.matmul %152, %10, %cst_58 {dimension_numbers = #tpu.dot_dimension_numbers<[1], [0], [0], [1], [0, 0, 1, 1], [], []>} : vector<8x8xbf16>, vector<8x32xbf16>, vector<8x32xf32> -> vector<8x32xf32>
    %154 = arith.addf %151, %153 : vector<8x32xf32>
    %155 = vector.extract_strided_slice %154 {offsets = [0, 0], sizes = [8, 24], strides = [1, 1]} : vector<8x32xf32> to vector<8x24xf32>
    %cst_59 = arith.constant 5.000000e-01 : f32
    %156 = vector.broadcast %cst_59 : f32 to vector<8x24xf32>
    %157 = arith.mulf %156, %155 : vector<8x24xf32>
    %158 = math.tanh %157 : vector<8x24xf32>
    %cst_60 = arith.constant 5.000000e-01 : f32
    %159 = vector.broadcast %cst_60 : f32 to vector<8x24xf32>
    %160 = arith.mulf %159, %158 : vector<8x24xf32>
    %cst_61 = arith.constant 5.000000e-01 : f32
    %161 = vector.broadcast %cst_61 : f32 to vector<8x24xf32>
    %162 = arith.addf %160, %161 : vector<8x24xf32>
    %163 = vector.extract_strided_slice %154 {offsets = [0, 24], sizes = [8, 8], strides = [1, 1]} : vector<8x32xf32> to vector<8x8xf32>
    %164 = math.tanh %163 : vector<8x8xf32>
    %165 = vector.extract_strided_slice %162 {offsets = [0, 0], sizes = [8, 8], strides = [1, 1]} : vector<8x24xf32> to vector<8x8xf32>
    %166 = vector.extract_strided_slice %162 {offsets = [0, 8], sizes = [8, 8], strides = [1, 1]} : vector<8x24xf32> to vector<8x8xf32>
    %167 = vector.extract_strided_slice %162 {offsets = [0, 16], sizes = [8, 8], strides = [1, 1]} : vector<8x24xf32> to vector<8x8xf32>
    %168 = arith.mulf %166, %147 : vector<8x8xf32>
    %169 = arith.mulf %165, %164 : vector<8x8xf32>
    %170 = arith.addf %168, %169 : vector<8x8xf32>
    %171 = math.tanh %170 : vector<8x8xf32>
    %172 = arith.mulf %167, %171 : vector<8x8xf32>
    %c48_62 = arith.constant 48 : index
    %c0_63 = arith.constant 0 : index
    %173 = vector.load %arg7[%c48_62, %c0_63] : memref<64x8xf32, #tpu.memory_space<vmem>>, vector<8x8xf32>
    tpu.vector_store %arg7[%c48_62, %c0_63], %172 {strides = array<i32>} : memref<64x8xf32, #tpu.memory_space<vmem>>, vector<8x8xf32>,
    %c56 = arith.constant 56 : index
    %c0_64 = arith.constant 0 : index
    %174 = vector.load %arg8[%c56, %c0_64] : memref<64x32xf32, #tpu.memory_space<vmem>>, vector<8x32xf32>
    %175 = arith.truncf %172 : vector<8x8xf32> to vector<8x8xbf16>
    %cst_65 = arith.constant dense<0.000000e+00> : vector<8x32xf32>
    %176 = tpu.matmul %175, %10, %cst_65 {dimension_numbers = #tpu.dot_dimension_numbers<[1], [0], [0], [1], [0, 0, 1, 1], [], []>} : vector<8x8xbf16>, vector<8x32xbf16>, vector<8x32xf32> -> vector<8x32xf32>
    %177 = arith.addf %174, %176 : vector<8x32xf32>
    %178 = vector.extract_strided_slice %177 {offsets = [0, 0], sizes = [8, 24], strides = [1, 1]} : vector<8x32xf32> to vector<8x24xf32>
    %cst_66 = arith.constant 5.000000e-01 : f32
    %179 = vector.broadcast %cst_66 : f32 to vector<8x24xf32>
    %180 = arith.mulf %179, %178 : vector<8x24xf32>
    %181 = math.tanh %180 : vector<8x24xf32>
    %cst_67 = arith.constant 5.000000e-01 : f32
    %182 = vector.broadcast %cst_67 : f32 to vector<8x24xf32>
    %183 = arith.mulf %182, %181 : vector<8x24xf32>
    %cst_68 = arith.constant 5.000000e-01 : f32
    %184 = vector.broadcast %cst_68 : f32 to vector<8x24xf32>
    %185 = arith.addf %183, %184 : vector<8x24xf32>
    %186 = vector.extract_strided_slice %177 {offsets = [0, 24], sizes = [8, 8], strides = [1, 1]} : vector<8x32xf32> to vector<8x8xf32>
    %187 = math.tanh %186 : vector<8x8xf32>
    %188 = vector.extract_strided_slice %185 {offsets = [0, 0], sizes = [8, 8], strides = [1, 1]} : vector<8x24xf32> to vector<8x8xf32>
    %189 = vector.extract_strided_slice %185 {offsets = [0, 8], sizes = [8, 8], strides = [1, 1]} : vector<8x24xf32> to vector<8x8xf32>
    %190 = vector.extract_strided_slice %185 {offsets = [0, 16], sizes = [8, 8], strides = [1, 1]} : vector<8x24xf32> to vector<8x8xf32>
    %191 = arith.mulf %189, %170 : vector<8x8xf32>
    %192 = arith.mulf %188, %187 : vector<8x8xf32>
    %193 = arith.addf %191, %192 : vector<8x8xf32>
    %194 = math.tanh %193 : vector<8x8xf32>
    %195 = arith.mulf %190, %194 : vector<8x8xf32>
    %c56_69 = arith.constant 56 : index
    %c0_70 = arith.constant 0 : index
    %196 = vector.load %arg7[%c56_69, %c0_70] : memref<64x8xf32, #tpu.memory_space<vmem>>, vector<8x8xf32>
    tpu.vector_store %arg7[%c56_69, %c0_70], %195 {strides = array<i32>} : memref<64x8xf32, #tpu.memory_space<vmem>>, vector<8x8xf32>,
    %c0_71 = arith.constant 0 : index
    %c0_72 = arith.constant 0 : index
    %197 = vector.load %arg7[%c0_71, %c0_72] : memref<64x8xf32, #tpu.memory_space<vmem>>, vector<64x8xf32>
    %198 = arith.truncf %197 : vector<64x8xf32> to vector<64x8xbf16>
    %c1 = arith.constant 1 : index
    %c0_73 = arith.constant 0 : index
    %c0_74 = arith.constant 0 : index
    %199 = vector.load %arg1[%c1, %c0_73, %c0_74] : memref<2x8x32xbf16, #tpu.memory_space<vmem>>, vector<1x8x32xbf16>
    %200 = vector.shape_cast %199 : vector<1x8x32xbf16> to vector<8x32xbf16>
    %cst_75 = arith.constant dense<0.000000e+00> : vector<64x32xf32>
    %201 = tpu.matmul %198, %200, %cst_75 {dimension_numbers = #tpu.dot_dimension_numbers<[1], [0], [0], [1], [0, 0, 1, 1], [], []>} : vector<64x8xbf16>, vector<8x32xbf16>, vector<64x32xf32> -> vector<64x32xf32>
    %c1_76 = arith.constant 1 : index
    %c0_77 = arith.constant 0 : index
    %c0_78 = arith.constant 0 : index
    %202 = vector.load %arg3[%c1_76, %c0_77, %c0_78] : memref<2x1x32xf32, #tpu.memory_space<vmem>>, vector<1x1x32xf32>
    %203 = vector.shape_cast %202 : vector<1x1x32xf32> to vector<1x32xf32>
    %204 = vector.broadcast %203 : vector<1x32xf32> to vector<64x32xf32>
    %205 = arith.addf %201, %204 : vector<64x32xf32>
    %c0_79 = arith.constant 0 : index
    %c0_80 = arith.constant 0 : index
    %206 = vector.load %arg8[%c0_79, %c0_80] : memref<64x32xf32, #tpu.memory_space<vmem>>, vector<64x32xf32>
    tpu.vector_store %arg8[%c0_79, %c0_80], %205 {strides = array<i32>} : memref<64x32xf32, #tpu.memory_space<vmem>>, vector<64x32xf32>,
    %c1_81 = arith.constant 1 : index
    %c0_82 = arith.constant 0 : index
    %c0_83 = arith.constant 0 : index
    %207 = vector.load %arg2[%c1_81, %c0_82, %c0_83] : memref<2x8x32xbf16, #tpu.memory_space<vmem>>, vector<1x8x32xbf16>
    %208 = vector.shape_cast %207 : vector<1x8x32xbf16> to vector<8x32xbf16>
    %cst_84 = arith.constant 0.000000e+00 : f32
    %209 = vector.broadcast %cst_84 : f32 to vector<8x8xf32>
    %cst_85 = arith.constant 0.000000e+00 : f32
    %210 = vector.broadcast %cst_85 : f32 to vector<8x8xf32>
    %c0_86 = arith.constant 0 : index
    %c0_87 = arith.constant 0 : index
    %211 = vector.load %arg8[%c0_86, %c0_87] : memref<64x32xf32, #tpu.memory_space<vmem>>, vector<8x32xf32>
    %212 = arith.truncf %209 : vector<8x8xf32> to vector<8x8xbf16>
    %cst_88 = arith.constant dense<0.000000e+00> : vector<8x32xf32>
    %213 = tpu.matmul %212, %208, %cst_88 {dimension_numbers = #tpu.dot_dimension_numbers<[1], [0], [0], [1], [0, 0, 1, 1], [], []>} : vector<8x8xbf16>, vector<8x32xbf16>, vector<8x32xf32> -> vector<8x32xf32>
    %214 = arith.addf %211, %213 : vector<8x32xf32>
    %215 = vector.extract_strided_slice %214 {offsets = [0, 0], sizes = [8, 24], strides = [1, 1]} : vector<8x32xf32> to vector<8x24xf32>
    %cst_89 = arith.constant 5.000000e-01 : f32
    %216 = vector.broadcast %cst_89 : f32 to vector<8x24xf32>
    %217 = arith.mulf %216, %215 : vector<8x24xf32>
    %218 = math.tanh %217 : vector<8x24xf32>
    %cst_90 = arith.constant 5.000000e-01 : f32
    %219 = vector.broadcast %cst_90 : f32 to vector<8x24xf32>
    %220 = arith.mulf %219, %218 : vector<8x24xf32>
    %cst_91 = arith.constant 5.000000e-01 : f32
    %221 = vector.broadcast %cst_91 : f32 to vector<8x24xf32>
    %222 = arith.addf %220, %221 : vector<8x24xf32>
    %223 = vector.extract_strided_slice %214 {offsets = [0, 24], sizes = [8, 8], strides = [1, 1]} : vector<8x32xf32> to vector<8x8xf32>
    %224 = math.tanh %223 : vector<8x8xf32>
    %225 = vector.extract_strided_slice %222 {offsets = [0, 0], sizes = [8, 8], strides = [1, 1]} : vector<8x24xf32> to vector<8x8xf32>
    %226 = vector.extract_strided_slice %222 {offsets = [0, 8], sizes = [8, 8], strides = [1, 1]} : vector<8x24xf32> to vector<8x8xf32>
    %227 = vector.extract_strided_slice %222 {offsets = [0, 16], sizes = [8, 8], strides = [1, 1]} : vector<8x24xf32> to vector<8x8xf32>
    %228 = arith.mulf %226, %210 : vector<8x8xf32>
    %229 = arith.mulf %225, %224 : vector<8x8xf32>
    %230 = arith.addf %228, %229 : vector<8x8xf32>
    %231 = math.tanh %230 : vector<8x8xf32>
    %232 = arith.mulf %227, %231 : vector<8x8xf32>
    %c0_92 = arith.constant 0 : index
    %c0_93 = arith.constant 0 : index
    %233 = vector.load %arg7[%c0_92, %c0_93] : memref<64x8xf32, #tpu.memory_space<vmem>>, vector<8x8xf32>
    tpu.vector_store %arg7[%c0_92, %c0_93], %232 {strides = array<i32>} : memref<64x8xf32, #tpu.memory_space<vmem>>, vector<8x8xf32>,
    %c8_94 = arith.constant 8 : index
    %c0_95 = arith.constant 0 : index
    %234 = vector.load %arg8[%c8_94, %c0_95] : memref<64x32xf32, #tpu.memory_space<vmem>>, vector<8x32xf32>
    %235 = arith.truncf %232 : vector<8x8xf32> to vector<8x8xbf16>
    %cst_96 = arith.constant dense<0.000000e+00> : vector<8x32xf32>
    %236 = tpu.matmul %235, %208, %cst_96 {dimension_numbers = #tpu.dot_dimension_numbers<[1], [0], [0], [1], [0, 0, 1, 1], [], []>} : vector<8x8xbf16>, vector<8x32xbf16>, vector<8x32xf32> -> vector<8x32xf32>
    %237 = arith.addf %234, %236 : vector<8x32xf32>
    %238 = vector.extract_strided_slice %237 {offsets = [0, 0], sizes = [8, 24], strides = [1, 1]} : vector<8x32xf32> to vector<8x24xf32>
    %cst_97 = arith.constant 5.000000e-01 : f32
    %239 = vector.broadcast %cst_97 : f32 to vector<8x24xf32>
    %240 = arith.mulf %239, %238 : vector<8x24xf32>
    %241 = math.tanh %240 : vector<8x24xf32>
    %cst_98 = arith.constant 5.000000e-01 : f32
    %242 = vector.broadcast %cst_98 : f32 to vector<8x24xf32>
    %243 = arith.mulf %242, %241 : vector<8x24xf32>
    %cst_99 = arith.constant 5.000000e-01 : f32
    %244 = vector.broadcast %cst_99 : f32 to vector<8x24xf32>
    %245 = arith.addf %243, %244 : vector<8x24xf32>
    %246 = vector.extract_strided_slice %237 {offsets = [0, 24], sizes = [8, 8], strides = [1, 1]} : vector<8x32xf32> to vector<8x8xf32>
    %247 = math.tanh %246 : vector<8x8xf32>
    %248 = vector.extract_strided_slice %245 {offsets = [0, 0], sizes = [8, 8], strides = [1, 1]} : vector<8x24xf32> to vector<8x8xf32>
    %249 = vector.extract_strided_slice %245 {offsets = [0, 8], sizes = [8, 8], strides = [1, 1]} : vector<8x24xf32> to vector<8x8xf32>
    %250 = vector.extract_strided_slice %245 {offsets = [0, 16], sizes = [8, 8], strides = [1, 1]} : vector<8x24xf32> to vector<8x8xf32>
    %251 = arith.mulf %249, %230 : vector<8x8xf32>
    %252 = arith.mulf %248, %247 : vector<8x8xf32>
    %253 = arith.addf %251, %252 : vector<8x8xf32>
    %254 = math.tanh %253 : vector<8x8xf32>
    %255 = arith.mulf %250, %254 : vector<8x8xf32>
    %c8_100 = arith.constant 8 : index
    %c0_101 = arith.constant 0 : index
    %256 = vector.load %arg7[%c8_100, %c0_101] : memref<64x8xf32, #tpu.memory_space<vmem>>, vector<8x8xf32>
    tpu.vector_store %arg7[%c8_100, %c0_101], %255 {strides = array<i32>} : memref<64x8xf32, #tpu.memory_space<vmem>>, vector<8x8xf32>,
    %c16_102 = arith.constant 16 : index
    %c0_103 = arith.constant 0 : index
    %257 = vector.load %arg8[%c16_102, %c0_103] : memref<64x32xf32, #tpu.memory_space<vmem>>, vector<8x32xf32>
    %258 = arith.truncf %255 : vector<8x8xf32> to vector<8x8xbf16>
    %cst_104 = arith.constant dense<0.000000e+00> : vector<8x32xf32>
    %259 = tpu.matmul %258, %208, %cst_104 {dimension_numbers = #tpu.dot_dimension_numbers<[1], [0], [0], [1], [0, 0, 1, 1], [], []>} : vector<8x8xbf16>, vector<8x32xbf16>, vector<8x32xf32> -> vector<8x32xf32>
    %260 = arith.addf %257, %259 : vector<8x32xf32>
    %261 = vector.extract_strided_slice %260 {offsets = [0, 0], sizes = [8, 24], strides = [1, 1]} : vector<8x32xf32> to vector<8x24xf32>
    %cst_105 = arith.constant 5.000000e-01 : f32
    %262 = vector.broadcast %cst_105 : f32 to vector<8x24xf32>
    %263 = arith.mulf %262, %261 : vector<8x24xf32>
    %264 = math.tanh %263 : vector<8x24xf32>
    %cst_106 = arith.constant 5.000000e-01 : f32
    %265 = vector.broadcast %cst_106 : f32 to vector<8x24xf32>
    %266 = arith.mulf %265, %264 : vector<8x24xf32>
    %cst_107 = arith.constant 5.000000e-01 : f32
    %267 = vector.broadcast %cst_107 : f32 to vector<8x24xf32>
    %268 = arith.addf %266, %267 : vector<8x24xf32>
    %269 = vector.extract_strided_slice %260 {offsets = [0, 24], sizes = [8, 8], strides = [1, 1]} : vector<8x32xf32> to vector<8x8xf32>
    %270 = math.tanh %269 : vector<8x8xf32>
    %271 = vector.extract_strided_slice %268 {offsets = [0, 0], sizes = [8, 8], strides = [1, 1]} : vector<8x24xf32> to vector<8x8xf32>
    %272 = vector.extract_strided_slice %268 {offsets = [0, 8], sizes = [8, 8], strides = [1, 1]} : vector<8x24xf32> to vector<8x8xf32>
    %273 = vector.extract_strided_slice %268 {offsets = [0, 16], sizes = [8, 8], strides = [1, 1]} : vector<8x24xf32> to vector<8x8xf32>
    %274 = arith.mulf %272, %253 : vector<8x8xf32>
    %275 = arith.mulf %271, %270 : vector<8x8xf32>
    %276 = arith.addf %274, %275 : vector<8x8xf32>
    %277 = math.tanh %276 : vector<8x8xf32>
    %278 = arith.mulf %273, %277 : vector<8x8xf32>
    %c16_108 = arith.constant 16 : index
    %c0_109 = arith.constant 0 : index
    %279 = vector.load %arg7[%c16_108, %c0_109] : memref<64x8xf32, #tpu.memory_space<vmem>>, vector<8x8xf32>
    tpu.vector_store %arg7[%c16_108, %c0_109], %278 {strides = array<i32>} : memref<64x8xf32, #tpu.memory_space<vmem>>, vector<8x8xf32>,
    %c24_110 = arith.constant 24 : index
    %c0_111 = arith.constant 0 : index
    %280 = vector.load %arg8[%c24_110, %c0_111] : memref<64x32xf32, #tpu.memory_space<vmem>>, vector<8x32xf32>
    %281 = arith.truncf %278 : vector<8x8xf32> to vector<8x8xbf16>
    %cst_112 = arith.constant dense<0.000000e+00> : vector<8x32xf32>
    %282 = tpu.matmul %281, %208, %cst_112 {dimension_numbers = #tpu.dot_dimension_numbers<[1], [0], [0], [1], [0, 0, 1, 1], [], []>} : vector<8x8xbf16>, vector<8x32xbf16>, vector<8x32xf32> -> vector<8x32xf32>
    %283 = arith.addf %280, %282 : vector<8x32xf32>
    %284 = vector.extract_strided_slice %283 {offsets = [0, 0], sizes = [8, 24], strides = [1, 1]} : vector<8x32xf32> to vector<8x24xf32>
    %cst_113 = arith.constant 5.000000e-01 : f32
    %285 = vector.broadcast %cst_113 : f32 to vector<8x24xf32>
    %286 = arith.mulf %285, %284 : vector<8x24xf32>
    %287 = math.tanh %286 : vector<8x24xf32>
    %cst_114 = arith.constant 5.000000e-01 : f32
    %288 = vector.broadcast %cst_114 : f32 to vector<8x24xf32>
    %289 = arith.mulf %288, %287 : vector<8x24xf32>
    %cst_115 = arith.constant 5.000000e-01 : f32
    %290 = vector.broadcast %cst_115 : f32 to vector<8x24xf32>
    %291 = arith.addf %289, %290 : vector<8x24xf32>
    %292 = vector.extract_strided_slice %283 {offsets = [0, 24], sizes = [8, 8], strides = [1, 1]} : vector<8x32xf32> to vector<8x8xf32>
    %293 = math.tanh %292 : vector<8x8xf32>
    %294 = vector.extract_strided_slice %291 {offsets = [0, 0], sizes = [8, 8], strides = [1, 1]} : vector<8x24xf32> to vector<8x8xf32>
    %295 = vector.extract_strided_slice %291 {offsets = [0, 8], sizes = [8, 8], strides = [1, 1]} : vector<8x24xf32> to vector<8x8xf32>
    %296 = vector.extract_strided_slice %291 {offsets = [0, 16], sizes = [8, 8], strides = [1, 1]} : vector<8x24xf32> to vector<8x8xf32>
    %297 = arith.mulf %295, %276 : vector<8x8xf32>
    %298 = arith.mulf %294, %293 : vector<8x8xf32>
    %299 = arith.addf %297, %298 : vector<8x8xf32>
    %300 = math.tanh %299 : vector<8x8xf32>
    %301 = arith.mulf %296, %300 : vector<8x8xf32>
    %c24_116 = arith.constant 24 : index
    %c0_117 = arith.constant 0 : index
    %302 = vector.load %arg7[%c24_116, %c0_117] : memref<64x8xf32, #tpu.memory_space<vmem>>, vector<8x8xf32>
    tpu.vector_store %arg7[%c24_116, %c0_117], %301 {strides = array<i32>} : memref<64x8xf32, #tpu.memory_space<vmem>>, vector<8x8xf32>,
    %c32_118 = arith.constant 32 : index
    %c0_119 = arith.constant 0 : index
    %303 = vector.load %arg8[%c32_118, %c0_119] : memref<64x32xf32, #tpu.memory_space<vmem>>, vector<8x32xf32>
    %304 = arith.truncf %301 : vector<8x8xf32> to vector<8x8xbf16>
    %cst_120 = arith.constant dense<0.000000e+00> : vector<8x32xf32>
    %305 = tpu.matmul %304, %208, %cst_120 {dimension_numbers = #tpu.dot_dimension_numbers<[1], [0], [0], [1], [0, 0, 1, 1], [], []>} : vector<8x8xbf16>, vector<8x32xbf16>, vector<8x32xf32> -> vector<8x32xf32>
    %306 = arith.addf %303, %305 : vector<8x32xf32>
    %307 = vector.extract_strided_slice %306 {offsets = [0, 0], sizes = [8, 24], strides = [1, 1]} : vector<8x32xf32> to vector<8x24xf32>
    %cst_121 = arith.constant 5.000000e-01 : f32
    %308 = vector.broadcast %cst_121 : f32 to vector<8x24xf32>
    %309 = arith.mulf %308, %307 : vector<8x24xf32>
    %310 = math.tanh %309 : vector<8x24xf32>
    %cst_122 = arith.constant 5.000000e-01 : f32
    %311 = vector.broadcast %cst_122 : f32 to vector<8x24xf32>
    %312 = arith.mulf %311, %310 : vector<8x24xf32>
    %cst_123 = arith.constant 5.000000e-01 : f32
    %313 = vector.broadcast %cst_123 : f32 to vector<8x24xf32>
    %314 = arith.addf %312, %313 : vector<8x24xf32>
    %315 = vector.extract_strided_slice %306 {offsets = [0, 24], sizes = [8, 8], strides = [1, 1]} : vector<8x32xf32> to vector<8x8xf32>
    %316 = math.tanh %315 : vector<8x8xf32>
    %317 = vector.extract_strided_slice %314 {offsets = [0, 0], sizes = [8, 8], strides = [1, 1]} : vector<8x24xf32> to vector<8x8xf32>
    %318 = vector.extract_strided_slice %314 {offsets = [0, 8], sizes = [8, 8], strides = [1, 1]} : vector<8x24xf32> to vector<8x8xf32>
    %319 = vector.extract_strided_slice %314 {offsets = [0, 16], sizes = [8, 8], strides = [1, 1]} : vector<8x24xf32> to vector<8x8xf32>
    %320 = arith.mulf %318, %299 : vector<8x8xf32>
    %321 = arith.mulf %317, %316 : vector<8x8xf32>
    %322 = arith.addf %320, %321 : vector<8x8xf32>
    %323 = math.tanh %322 : vector<8x8xf32>
    %324 = arith.mulf %319, %323 : vector<8x8xf32>
    %c32_124 = arith.constant 32 : index
    %c0_125 = arith.constant 0 : index
    %325 = vector.load %arg7[%c32_124, %c0_125] : memref<64x8xf32, #tpu.memory_space<vmem>>, vector<8x8xf32>
    tpu.vector_store %arg7[%c32_124, %c0_125], %324 {strides = array<i32>} : memref<64x8xf32, #tpu.memory_space<vmem>>, vector<8x8xf32>,
    %c40_126 = arith.constant 40 : index
    %c0_127 = arith.constant 0 : index
    %326 = vector.load %arg8[%c40_126, %c0_127] : memref<64x32xf32, #tpu.memory_space<vmem>>, vector<8x32xf32>
    %327 = arith.truncf %324 : vector<8x8xf32> to vector<8x8xbf16>
    %cst_128 = arith.constant dense<0.000000e+00> : vector<8x32xf32>
    %328 = tpu.matmul %327, %208, %cst_128 {dimension_numbers = #tpu.dot_dimension_numbers<[1], [0], [0], [1], [0, 0, 1, 1], [], []>} : vector<8x8xbf16>, vector<8x32xbf16>, vector<8x32xf32> -> vector<8x32xf32>
    %329 = arith.addf %326, %328 : vector<8x32xf32>
    %330 = vector.extract_strided_slice %329 {offsets = [0, 0], sizes = [8, 24], strides = [1, 1]} : vector<8x32xf32> to vector<8x24xf32>
    %cst_129 = arith.constant 5.000000e-01 : f32
    %331 = vector.broadcast %cst_129 : f32 to vector<8x24xf32>
    %332 = arith.mulf %331, %330 : vector<8x24xf32>
    %333 = math.tanh %332 : vector<8x24xf32>
    %cst_130 = arith.constant 5.000000e-01 : f32
    %334 = vector.broadcast %cst_130 : f32 to vector<8x24xf32>
    %335 = arith.mulf %334, %333 : vector<8x24xf32>
    %cst_131 = arith.constant 5.000000e-01 : f32
    %336 = vector.broadcast %cst_131 : f32 to vector<8x24xf32>
    %337 = arith.addf %335, %336 : vector<8x24xf32>
    %338 = vector.extract_strided_slice %329 {offsets = [0, 24], sizes = [8, 8], strides = [1, 1]} : vector<8x32xf32> to vector<8x8xf32>
    %339 = math.tanh %338 : vector<8x8xf32>
    %340 = vector.extract_strided_slice %337 {offsets = [0, 0], sizes = [8, 8], strides = [1, 1]} : vector<8x24xf32> to vector<8x8xf32>
    %341 = vector.extract_strided_slice %337 {offsets = [0, 8], sizes = [8, 8], strides = [1, 1]} : vector<8x24xf32> to vector<8x8xf32>
    %342 = vector.extract_strided_slice %337 {offsets = [0, 16], sizes = [8, 8], strides = [1, 1]} : vector<8x24xf32> to vector<8x8xf32>
    %343 = arith.mulf %341, %322 : vector<8x8xf32>
    %344 = arith.mulf %340, %339 : vector<8x8xf32>
    %345 = arith.addf %343, %344 : vector<8x8xf32>
    %346 = math.tanh %345 : vector<8x8xf32>
    %347 = arith.mulf %342, %346 : vector<8x8xf32>
    %c40_132 = arith.constant 40 : index
    %c0_133 = arith.constant 0 : index
    %348 = vector.load %arg7[%c40_132, %c0_133] : memref<64x8xf32, #tpu.memory_space<vmem>>, vector<8x8xf32>
    tpu.vector_store %arg7[%c40_132, %c0_133], %347 {strides = array<i32>} : memref<64x8xf32, #tpu.memory_space<vmem>>, vector<8x8xf32>,
    %c48_134 = arith.constant 48 : index
    %c0_135 = arith.constant 0 : index
    %349 = vector.load %arg8[%c48_134, %c0_135] : memref<64x32xf32, #tpu.memory_space<vmem>>, vector<8x32xf32>
    %350 = arith.truncf %347 : vector<8x8xf32> to vector<8x8xbf16>
    %cst_136 = arith.constant dense<0.000000e+00> : vector<8x32xf32>
    %351 = tpu.matmul %350, %208, %cst_136 {dimension_numbers = #tpu.dot_dimension_numbers<[1], [0], [0], [1], [0, 0, 1, 1], [], []>} : vector<8x8xbf16>, vector<8x32xbf16>, vector<8x32xf32> -> vector<8x32xf32>
    %352 = arith.addf %349, %351 : vector<8x32xf32>
    %353 = vector.extract_strided_slice %352 {offsets = [0, 0], sizes = [8, 24], strides = [1, 1]} : vector<8x32xf32> to vector<8x24xf32>
    %cst_137 = arith.constant 5.000000e-01 : f32
    %354 = vector.broadcast %cst_137 : f32 to vector<8x24xf32>
    %355 = arith.mulf %354, %353 : vector<8x24xf32>
    %356 = math.tanh %355 : vector<8x24xf32>
    %cst_138 = arith.constant 5.000000e-01 : f32
    %357 = vector.broadcast %cst_138 : f32 to vector<8x24xf32>
    %358 = arith.mulf %357, %356 : vector<8x24xf32>
    %cst_139 = arith.constant 5.000000e-01 : f32
    %359 = vector.broadcast %cst_139 : f32 to vector<8x24xf32>
    %360 = arith.addf %358, %359 : vector<8x24xf32>
    %361 = vector.extract_strided_slice %352 {offsets = [0, 24], sizes = [8, 8], strides = [1, 1]} : vector<8x32xf32> to vector<8x8xf32>
    %362 = math.tanh %361 : vector<8x8xf32>
    %363 = vector.extract_strided_slice %360 {offsets = [0, 0], sizes = [8, 8], strides = [1, 1]} : vector<8x24xf32> to vector<8x8xf32>
    %364 = vector.extract_strided_slice %360 {offsets = [0, 8], sizes = [8, 8], strides = [1, 1]} : vector<8x24xf32> to vector<8x8xf32>
    %365 = vector.extract_strided_slice %360 {offsets = [0, 16], sizes = [8, 8], strides = [1, 1]} : vector<8x24xf32> to vector<8x8xf32>
    %366 = arith.mulf %364, %345 : vector<8x8xf32>
    %367 = arith.mulf %363, %362 : vector<8x8xf32>
    %368 = arith.addf %366, %367 : vector<8x8xf32>
    %369 = math.tanh %368 : vector<8x8xf32>
    %370 = arith.mulf %365, %369 : vector<8x8xf32>
    %c48_140 = arith.constant 48 : index
    %c0_141 = arith.constant 0 : index
    %371 = vector.load %arg7[%c48_140, %c0_141] : memref<64x8xf32, #tpu.memory_space<vmem>>, vector<8x8xf32>
    tpu.vector_store %arg7[%c48_140, %c0_141], %370 {strides = array<i32>} : memref<64x8xf32, #tpu.memory_space<vmem>>, vector<8x8xf32>,
    %c56_142 = arith.constant 56 : index
    %c0_143 = arith.constant 0 : index
    %372 = vector.load %arg8[%c56_142, %c0_143] : memref<64x32xf32, #tpu.memory_space<vmem>>, vector<8x32xf32>
    %373 = arith.truncf %370 : vector<8x8xf32> to vector<8x8xbf16>
    %cst_144 = arith.constant dense<0.000000e+00> : vector<8x32xf32>
    %374 = tpu.matmul %373, %208, %cst_144 {dimension_numbers = #tpu.dot_dimension_numbers<[1], [0], [0], [1], [0, 0, 1, 1], [], []>} : vector<8x8xbf16>, vector<8x32xbf16>, vector<8x32xf32> -> vector<8x32xf32>
    %375 = arith.addf %372, %374 : vector<8x32xf32>
    %376 = vector.extract_strided_slice %375 {offsets = [0, 0], sizes = [8, 24], strides = [1, 1]} : vector<8x32xf32> to vector<8x24xf32>
    %cst_145 = arith.constant 5.000000e-01 : f32
    %377 = vector.broadcast %cst_145 : f32 to vector<8x24xf32>
    %378 = arith.mulf %377, %376 : vector<8x24xf32>
    %379 = math.tanh %378 : vector<8x24xf32>
    %cst_146 = arith.constant 5.000000e-01 : f32
    %380 = vector.broadcast %cst_146 : f32 to vector<8x24xf32>
    %381 = arith.mulf %380, %379 : vector<8x24xf32>
    %cst_147 = arith.constant 5.000000e-01 : f32
    %382 = vector.broadcast %cst_147 : f32 to vector<8x24xf32>
    %383 = arith.addf %381, %382 : vector<8x24xf32>
    %384 = vector.extract_strided_slice %375 {offsets = [0, 24], sizes = [8, 8], strides = [1, 1]} : vector<8x32xf32> to vector<8x8xf32>
    %385 = math.tanh %384 : vector<8x8xf32>
    %386 = vector.extract_strided_slice %383 {offsets = [0, 0], sizes = [8, 8], strides = [1, 1]} : vector<8x24xf32> to vector<8x8xf32>
    %387 = vector.extract_strided_slice %383 {offsets = [0, 8], sizes = [8, 8], strides = [1, 1]} : vector<8x24xf32> to vector<8x8xf32>
    %388 = vector.extract_strided_slice %383 {offsets = [0, 16], sizes = [8, 8], strides = [1, 1]} : vector<8x24xf32> to vector<8x8xf32>
    %389 = arith.mulf %387, %368 : vector<8x8xf32>
    %390 = arith.mulf %386, %385 : vector<8x8xf32>
    %391 = arith.addf %389, %390 : vector<8x8xf32>
    %392 = math.tanh %391 : vector<8x8xf32>
    %393 = arith.mulf %388, %392 : vector<8x8xf32>
    %c56_148 = arith.constant 56 : index
    %c0_149 = arith.constant 0 : index
    %394 = vector.load %arg7[%c56_148, %c0_149] : memref<64x8xf32, #tpu.memory_space<vmem>>, vector<8x8xf32>
    tpu.vector_store %arg7[%c56_148, %c0_149], %393 {strides = array<i32>} : memref<64x8xf32, #tpu.memory_space<vmem>>, vector<8x8xf32>,
    %cst_150 = arith.constant 0.000000e+00 : f32
    %395 = vector.broadcast %cst_150 : f32 to vector<8x8xf32>
    %cst_151 = arith.constant 0.000000e+00 : f32
    %396 = vector.broadcast %cst_151 : f32 to vector<8x8xf32>
    %cst_152 = arith.constant 0.000000e+00 : f32
    %397 = vector.broadcast %cst_152 : f32 to vector<8x8xf32>
    %cst_153 = arith.constant 0.000000e+00 : f32
    %398 = vector.broadcast %cst_153 : f32 to vector<8x8xf32>
    %c0_154 = arith.constant 0 : index
    %c0_155 = arith.constant 0 : index
    %399 = vector.load %arg7[%c0_154, %c0_155] : memref<64x8xf32, #tpu.memory_space<vmem>>, vector<8x8xf32>
    %c0_156 = arith.constant 0 : index
    %c0_157 = arith.constant 0 : index
    %400 = memref.load %arg4[%c0_156, %c0_157] : memref<4x8xf32, #tpu.memory_space<smem>>
    %401 = vector.broadcast %400 : f32 to vector<8x8xf32>
    %402 = arith.mulf %401, %399 : vector<8x8xf32>
    %403 = arith.addf %395, %402 : vector<8x8xf32>
    %c1_158 = arith.constant 1 : index
    %c0_159 = arith.constant 0 : index
    %404 = memref.load %arg4[%c1_158, %c0_159] : memref<4x8xf32, #tpu.memory_space<smem>>
    %405 = vector.broadcast %404 : f32 to vector<8x8xf32>
    %406 = arith.mulf %405, %399 : vector<8x8xf32>
    %407 = arith.addf %396, %406 : vector<8x8xf32>
    %c2 = arith.constant 2 : index
    %c0_160 = arith.constant 0 : index
    %408 = memref.load %arg4[%c2, %c0_160] : memref<4x8xf32, #tpu.memory_space<smem>>
    %409 = vector.broadcast %408 : f32 to vector<8x8xf32>
    %410 = arith.mulf %409, %399 : vector<8x8xf32>
    %411 = arith.addf %397, %410 : vector<8x8xf32>
    %c3 = arith.constant 3 : index
    %c0_161 = arith.constant 0 : index
    %412 = memref.load %arg4[%c3, %c0_161] : memref<4x8xf32, #tpu.memory_space<smem>>
    %413 = vector.broadcast %412 : f32 to vector<8x8xf32>
    %414 = arith.mulf %413, %399 : vector<8x8xf32>
    %415 = arith.addf %398, %414 : vector<8x8xf32>
    %c8_162 = arith.constant 8 : index
    %c0_163 = arith.constant 0 : index
    %416 = vector.load %arg7[%c8_162, %c0_163] : memref<64x8xf32, #tpu.memory_space<vmem>>, vector<8x8xf32>
    %c0_164 = arith.constant 0 : index
    %c1_165 = arith.constant 1 : index
    %417 = memref.load %arg4[%c0_164, %c1_165] : memref<4x8xf32, #tpu.memory_space<smem>>
    %418 = vector.broadcast %417 : f32 to vector<8x8xf32>
    %419 = arith.mulf %418, %416 : vector<8x8xf32>
    %420 = arith.addf %403, %419 : vector<8x8xf32>
    %c1_166 = arith.constant 1 : index
    %c1_167 = arith.constant 1 : index
    %421 = memref.load %arg4[%c1_166, %c1_167] : memref<4x8xf32, #tpu.memory_space<smem>>
    %422 = vector.broadcast %421 : f32 to vector<8x8xf32>
    %423 = arith.mulf %422, %416 : vector<8x8xf32>
    %424 = arith.addf %407, %423 : vector<8x8xf32>
    %c2_168 = arith.constant 2 : index
    %c1_169 = arith.constant 1 : index
    %425 = memref.load %arg4[%c2_168, %c1_169] : memref<4x8xf32, #tpu.memory_space<smem>>
    %426 = vector.broadcast %425 : f32 to vector<8x8xf32>
    %427 = arith.mulf %426, %416 : vector<8x8xf32>
    %428 = arith.addf %411, %427 : vector<8x8xf32>
    %c3_170 = arith.constant 3 : index
    %c1_171 = arith.constant 1 : index
    %429 = memref.load %arg4[%c3_170, %c1_171] : memref<4x8xf32, #tpu.memory_space<smem>>
    %430 = vector.broadcast %429 : f32 to vector<8x8xf32>
    %431 = arith.mulf %430, %416 : vector<8x8xf32>
    %432 = arith.addf %415, %431 : vector<8x8xf32>
    %c16_172 = arith.constant 16 : index
    %c0_173 = arith.constant 0 : index
    %433 = vector.load %arg7[%c16_172, %c0_173] : memref<64x8xf32, #tpu.memory_space<vmem>>, vector<8x8xf32>
    %c0_174 = arith.constant 0 : index
    %c2_175 = arith.constant 2 : index
    %434 = memref.load %arg4[%c0_174, %c2_175] : memref<4x8xf32, #tpu.memory_space<smem>>
    %435 = vector.broadcast %434 : f32 to vector<8x8xf32>
    %436 = arith.mulf %435, %433 : vector<8x8xf32>
    %437 = arith.addf %420, %436 : vector<8x8xf32>
    %c1_176 = arith.constant 1 : index
    %c2_177 = arith.constant 2 : index
    %438 = memref.load %arg4[%c1_176, %c2_177] : memref<4x8xf32, #tpu.memory_space<smem>>
    %439 = vector.broadcast %438 : f32 to vector<8x8xf32>
    %440 = arith.mulf %439, %433 : vector<8x8xf32>
    %441 = arith.addf %424, %440 : vector<8x8xf32>
    %c2_178 = arith.constant 2 : index
    %c2_179 = arith.constant 2 : index
    %442 = memref.load %arg4[%c2_178, %c2_179] : memref<4x8xf32, #tpu.memory_space<smem>>
    %443 = vector.broadcast %442 : f32 to vector<8x8xf32>
    %444 = arith.mulf %443, %433 : vector<8x8xf32>
    %445 = arith.addf %428, %444 : vector<8x8xf32>
    %c3_180 = arith.constant 3 : index
    %c2_181 = arith.constant 2 : index
    %446 = memref.load %arg4[%c3_180, %c2_181] : memref<4x8xf32, #tpu.memory_space<smem>>
    %447 = vector.broadcast %446 : f32 to vector<8x8xf32>
    %448 = arith.mulf %447, %433 : vector<8x8xf32>
    %449 = arith.addf %432, %448 : vector<8x8xf32>
    %c24_182 = arith.constant 24 : index
    %c0_183 = arith.constant 0 : index
    %450 = vector.load %arg7[%c24_182, %c0_183] : memref<64x8xf32, #tpu.memory_space<vmem>>, vector<8x8xf32>
    %c0_184 = arith.constant 0 : index
    %c3_185 = arith.constant 3 : index
    %451 = memref.load %arg4[%c0_184, %c3_185] : memref<4x8xf32, #tpu.memory_space<smem>>
    %452 = vector.broadcast %451 : f32 to vector<8x8xf32>
    %453 = arith.mulf %452, %450 : vector<8x8xf32>
    %454 = arith.addf %437, %453 : vector<8x8xf32>
    %c1_186 = arith.constant 1 : index
    %c3_187 = arith.constant 3 : index
    %455 = memref.load %arg4[%c1_186, %c3_187] : memref<4x8xf32, #tpu.memory_space<smem>>
    %456 = vector.broadcast %455 : f32 to vector<8x8xf32>
    %457 = arith.mulf %456, %450 : vector<8x8xf32>
    %458 = arith.addf %441, %457 : vector<8x8xf32>
    %c2_188 = arith.constant 2 : index
    %c3_189 = arith.constant 3 : index
    %459 = memref.load %arg4[%c2_188, %c3_189] : memref<4x8xf32, #tpu.memory_space<smem>>
    %460 = vector.broadcast %459 : f32 to vector<8x8xf32>
    %461 = arith.mulf %460, %450 : vector<8x8xf32>
    %462 = arith.addf %445, %461 : vector<8x8xf32>
    %c3_190 = arith.constant 3 : index
    %c3_191 = arith.constant 3 : index
    %463 = memref.load %arg4[%c3_190, %c3_191] : memref<4x8xf32, #tpu.memory_space<smem>>
    %464 = vector.broadcast %463 : f32 to vector<8x8xf32>
    %465 = arith.mulf %464, %450 : vector<8x8xf32>
    %466 = arith.addf %449, %465 : vector<8x8xf32>
    %c32_192 = arith.constant 32 : index
    %c0_193 = arith.constant 0 : index
    %467 = vector.load %arg7[%c32_192, %c0_193] : memref<64x8xf32, #tpu.memory_space<vmem>>, vector<8x8xf32>
    %c0_194 = arith.constant 0 : index
    %c4 = arith.constant 4 : index
    %468 = memref.load %arg4[%c0_194, %c4] : memref<4x8xf32, #tpu.memory_space<smem>>
    %469 = vector.broadcast %468 : f32 to vector<8x8xf32>
    %470 = arith.mulf %469, %467 : vector<8x8xf32>
    %471 = arith.addf %454, %470 : vector<8x8xf32>
    %c1_195 = arith.constant 1 : index
    %c4_196 = arith.constant 4 : index
    %472 = memref.load %arg4[%c1_195, %c4_196] : memref<4x8xf32, #tpu.memory_space<smem>>
    %473 = vector.broadcast %472 : f32 to vector<8x8xf32>
    %474 = arith.mulf %473, %467 : vector<8x8xf32>
    %475 = arith.addf %458, %474 : vector<8x8xf32>
    %c2_197 = arith.constant 2 : index
    %c4_198 = arith.constant 4 : index
    %476 = memref.load %arg4[%c2_197, %c4_198] : memref<4x8xf32, #tpu.memory_space<smem>>
    %477 = vector.broadcast %476 : f32 to vector<8x8xf32>
    %478 = arith.mulf %477, %467 : vector<8x8xf32>
    %479 = arith.addf %462, %478 : vector<8x8xf32>
    %c3_199 = arith.constant 3 : index
    %c4_200 = arith.constant 4 : index
    %480 = memref.load %arg4[%c3_199, %c4_200] : memref<4x8xf32, #tpu.memory_space<smem>>
    %481 = vector.broadcast %480 : f32 to vector<8x8xf32>
    %482 = arith.mulf %481, %467 : vector<8x8xf32>
    %483 = arith.addf %466, %482 : vector<8x8xf32>
    %c40_201 = arith.constant 40 : index
    %c0_202 = arith.constant 0 : index
    %484 = vector.load %arg7[%c40_201, %c0_202] : memref<64x8xf32, #tpu.memory_space<vmem>>, vector<8x8xf32>
    %c0_203 = arith.constant 0 : index
    %c5 = arith.constant 5 : index
    %485 = memref.load %arg4[%c0_203, %c5] : memref<4x8xf32, #tpu.memory_space<smem>>
    %486 = vector.broadcast %485 : f32 to vector<8x8xf32>
    %487 = arith.mulf %486, %484 : vector<8x8xf32>
    %488 = arith.addf %471, %487 : vector<8x8xf32>
    %c1_204 = arith.constant 1 : index
    %c5_205 = arith.constant 5 : index
    %489 = memref.load %arg4[%c1_204, %c5_205] : memref<4x8xf32, #tpu.memory_space<smem>>
    %490 = vector.broadcast %489 : f32 to vector<8x8xf32>
    %491 = arith.mulf %490, %484 : vector<8x8xf32>
    %492 = arith.addf %475, %491 : vector<8x8xf32>
    %c2_206 = arith.constant 2 : index
    %c5_207 = arith.constant 5 : index
    %493 = memref.load %arg4[%c2_206, %c5_207] : memref<4x8xf32, #tpu.memory_space<smem>>
    %494 = vector.broadcast %493 : f32 to vector<8x8xf32>
    %495 = arith.mulf %494, %484 : vector<8x8xf32>
    %496 = arith.addf %479, %495 : vector<8x8xf32>
    %c3_208 = arith.constant 3 : index
    %c5_209 = arith.constant 5 : index
    %497 = memref.load %arg4[%c3_208, %c5_209] : memref<4x8xf32, #tpu.memory_space<smem>>
    %498 = vector.broadcast %497 : f32 to vector<8x8xf32>
    %499 = arith.mulf %498, %484 : vector<8x8xf32>
    %500 = arith.addf %483, %499 : vector<8x8xf32>
    %c48_210 = arith.constant 48 : index
    %c0_211 = arith.constant 0 : index
    %501 = vector.load %arg7[%c48_210, %c0_211] : memref<64x8xf32, #tpu.memory_space<vmem>>, vector<8x8xf32>
    %c0_212 = arith.constant 0 : index
    %c6 = arith.constant 6 : index
    %502 = memref.load %arg4[%c0_212, %c6] : memref<4x8xf32, #tpu.memory_space<smem>>
    %503 = vector.broadcast %502 : f32 to vector<8x8xf32>
    %504 = arith.mulf %503, %501 : vector<8x8xf32>
    %505 = arith.addf %488, %504 : vector<8x8xf32>
    %c1_213 = arith.constant 1 : index
    %c6_214 = arith.constant 6 : index
    %506 = memref.load %arg4[%c1_213, %c6_214] : memref<4x8xf32, #tpu.memory_space<smem>>
    %507 = vector.broadcast %506 : f32 to vector<8x8xf32>
    %508 = arith.mulf %507, %501 : vector<8x8xf32>
    %509 = arith.addf %492, %508 : vector<8x8xf32>
    %c2_215 = arith.constant 2 : index
    %c6_216 = arith.constant 6 : index
    %510 = memref.load %arg4[%c2_215, %c6_216] : memref<4x8xf32, #tpu.memory_space<smem>>
    %511 = vector.broadcast %510 : f32 to vector<8x8xf32>
    %512 = arith.mulf %511, %501 : vector<8x8xf32>
    %513 = arith.addf %496, %512 : vector<8x8xf32>
    %c3_217 = arith.constant 3 : index
    %c6_218 = arith.constant 6 : index
    %514 = memref.load %arg4[%c3_217, %c6_218] : memref<4x8xf32, #tpu.memory_space<smem>>
    %515 = vector.broadcast %514 : f32 to vector<8x8xf32>
    %516 = arith.mulf %515, %501 : vector<8x8xf32>
    %517 = arith.addf %500, %516 : vector<8x8xf32>
    %c56_219 = arith.constant 56 : index
    %c0_220 = arith.constant 0 : index
    %518 = vector.load %arg7[%c56_219, %c0_220] : memref<64x8xf32, #tpu.memory_space<vmem>>, vector<8x8xf32>
    %c0_221 = arith.constant 0 : index
    %c7 = arith.constant 7 : index
    %519 = memref.load %arg4[%c0_221, %c7] : memref<4x8xf32, #tpu.memory_space<smem>>
    %520 = vector.broadcast %519 : f32 to vector<8x8xf32>
    %521 = arith.mulf %520, %518 : vector<8x8xf32>
    %522 = arith.addf %505, %521 : vector<8x8xf32>
    %c1_222 = arith.constant 1 : index
    %c7_223 = arith.constant 7 : index
    %523 = memref.load %arg4[%c1_222, %c7_223] : memref<4x8xf32, #tpu.memory_space<smem>>
    %524 = vector.broadcast %523 : f32 to vector<8x8xf32>
    %525 = arith.mulf %524, %518 : vector<8x8xf32>
    %526 = arith.addf %509, %525 : vector<8x8xf32>
    %c2_224 = arith.constant 2 : index
    %c7_225 = arith.constant 7 : index
    %527 = memref.load %arg4[%c2_224, %c7_225] : memref<4x8xf32, #tpu.memory_space<smem>>
    %528 = vector.broadcast %527 : f32 to vector<8x8xf32>
    %529 = arith.mulf %528, %518 : vector<8x8xf32>
    %530 = arith.addf %513, %529 : vector<8x8xf32>
    %c3_226 = arith.constant 3 : index
    %c7_227 = arith.constant 7 : index
    %531 = memref.load %arg4[%c3_226, %c7_227] : memref<4x8xf32, #tpu.memory_space<smem>>
    %532 = vector.broadcast %531 : f32 to vector<8x8xf32>
    %533 = arith.mulf %532, %518 : vector<8x8xf32>
    %534 = arith.addf %517, %533 : vector<8x8xf32>
    %c0_228 = arith.constant 0 : index
    %c0_229 = arith.constant 0 : index
    %535 = memref.load %arg5[%c0_228, %c0_229] : memref<4x1xf32, #tpu.memory_space<smem>>
    %536 = vector.broadcast %535 : f32 to vector<8x8xf32>
    %537 = arith.addf %522, %536 : vector<8x8xf32>
    %c0_230 = arith.constant 0 : index
    %c0_231 = arith.constant 0 : index
    %538 = vector.load %arg6[%c0_230, %c0_231] : memref<32x8xf32, #tpu.memory_space<vmem>>, vector<8x8xf32>
    tpu.vector_store %arg6[%c0_230, %c0_231], %537 {strides = array<i32>} : memref<32x8xf32, #tpu.memory_space<vmem>>, vector<8x8xf32>,
    %c1_232 = arith.constant 1 : index
    %c0_233 = arith.constant 0 : index
    %539 = memref.load %arg5[%c1_232, %c0_233] : memref<4x1xf32, #tpu.memory_space<smem>>
    %540 = vector.broadcast %539 : f32 to vector<8x8xf32>
    %541 = arith.addf %526, %540 : vector<8x8xf32>
    %c8_234 = arith.constant 8 : index
    %c0_235 = arith.constant 0 : index
    %542 = vector.load %arg6[%c8_234, %c0_235] : memref<32x8xf32, #tpu.memory_space<vmem>>, vector<8x8xf32>
    tpu.vector_store %arg6[%c8_234, %c0_235], %541 {strides = array<i32>} : memref<32x8xf32, #tpu.memory_space<vmem>>, vector<8x8xf32>,
    %c2_236 = arith.constant 2 : index
    %c0_237 = arith.constant 0 : index
    %543 = memref.load %arg5[%c2_236, %c0_237] : memref<4x1xf32, #tpu.memory_space<smem>>
    %544 = vector.broadcast %543 : f32 to vector<8x8xf32>
    %545 = arith.addf %530, %544 : vector<8x8xf32>
    %c16_238 = arith.constant 16 : index
    %c0_239 = arith.constant 0 : index
    %546 = vector.load %arg6[%c16_238, %c0_239] : memref<32x8xf32, #tpu.memory_space<vmem>>, vector<8x8xf32>
    tpu.vector_store %arg6[%c16_238, %c0_239], %545 {strides = array<i32>} : memref<32x8xf32, #tpu.memory_space<vmem>>, vector<8x8xf32>,
    %c3_240 = arith.constant 3 : index
    %c0_241 = arith.constant 0 : index
    %547 = memref.load %arg5[%c3_240, %c0_241] : memref<4x1xf32, #tpu.memory_space<smem>>
    %548 = vector.broadcast %547 : f32 to vector<8x8xf32>
    %549 = arith.addf %534, %548 : vector<8x8xf32>
    %c24_242 = arith.constant 24 : index
    %c0_243 = arith.constant 0 : index
    %550 = vector.load %arg6[%c24_242, %c0_243] : memref<32x8xf32, #tpu.memory_space<vmem>>, vector<8x8xf32>
    tpu.vector_store %arg6[%c24_242, %c0_243], %549 {strides = array<i32>} : memref<32x8xf32, #tpu.memory_space<vmem>>, vector<8x8xf32>,
    return
  }
}

</mosaic_0001>

<bundles_post_ra>
// kernel: lstm_model_forward.1
= control target key start
LH: loop header
LB: loop body
LE: loop exit
PB: predicated region body
PF: predicated region fallthrough
CT: control target
= control target key end

     0   :  { %11 = vsyncpa [#allocation5], 0  ;;  %s2495_s0 = inlined_call_operand.vmem [shape: bf16[64,8], index: 0, kind: input, shape index: {}]   ;;  %s2496_s1 = inlined_call_operand.vmem [shape: bf16[2,8,32], index: 1, kind: input, shape index: {}]   ;;  %s2497_s2 = inlined_call_operand.vmem [shape: bf16[2,8,32], index: 2, kind: input, shape index: {}]   ;;  %s2498_s3 = inlined_call_operand.vmem [shape: f32[2,1,32], index: 3, kind: input, shape index: {}]   ;;  %s2499_s4 = inlined_call_operand.vmem [shape: f32[4,8], index: 4, kind: input, shape index: {}]   ;;  %s2500_s5 = inlined_call_operand.vmem [shape: f32[4,1], index: 5, kind: input, shape index: {}]   ;;  %s2501_s6 = inlined_call_operand.vmem [shape: f32[32,8], index: 6, kind: output, shape index: {}]  }
   0x1   :  { %s27_s23 = sshll.u32 %s2499_s4, 4  ;;  %s28_s23 = int_to_ptr.vmem [resolvable:$true] %s27_s23 }
   0x2   :  { %12 = vsyncpa [#allocation7], 0  ;;  %s37_s26 = sshll.u32 %s2500_s5, 4  ;;  %s1991_s27 = scalar_lea.vmem %s28_s23, 64  ;;  %s38_s26 = int_to_ptr.vmem [resolvable:$true] %s37_s26 }
   0x3   :  { %p1992_p0 = scmp.ne.s32.totalorder %s28_s23, %s1991_s27  ;;  %p1996_p1 = scmp.lt.s32.totalorder %s28_s23, %s28_s23 }
   0x4   :  { %p1997_p2 = scmp.lt.s32.totalorder %s1991_s27, %s1991_s27 }
   0x6   :  { %p1998_p3 = por %p1997_p2, %p1996_p1 }
   0x8   :  { %p1999_p4 = pnand %p1998_p3, %p1992_p0 }
   0xa   :  { %2002 = shalt.err (!%p1999_p4)
}
   0xb   :  { %s2019_s28 = smov [#allocation4]   ;;  %s2003_s29 = scalar_lea.vmem %s38_s26, 64 }
   0xc   :  { %30 = dma.vmem_to_smem %s28_s23, 64, %s2019_s28, [#allocation5]  }
   0xd   :  { %p2004_p5 = scmp.ne.s32.totalorder %s38_s26, %s2003_s29  ;;  %p2008_p6 = scmp.lt.s32.totalorder %s38_s26, %s38_s26 }
   0xe   :  { %p2009_p7 = scmp.lt.s32.totalorder %s2003_s29, %s2003_s29 }
  0x10   :  { %p2010_p8 = por %p2009_p7, %p2008_p6 }
  0x12   :  { %p2011_p9 = pnand %p2010_p8, %p2004_p5 }
  0x14   :  { %2014 = shalt.err (!%p2011_p9)
}
  0x15   :  { %s2020_s4 = smov [#allocation6]  }
  0x16   :  { %40 = dma.vmem_to_smem %s38_s26, 64, %s2020_s4, [#allocation7]  }
  0x17   :  { %2015 = dma.done.wait [#allocation5], 64  }
  0x18   :  { %2016 = vsyncadd [#allocation5], 4294967232 }
  0x19   :  { %2017 = dma.done.wait [#allocation7], 64  }
  0x1a   :  { %2018 = vsyncadd [#allocation7], 4294967232 }
  0x1b   :  { %47 = sfence }
  0x1c   :  { %v57_v0 = vld [vmem:[%s2496_s1] sm:$0xf]  ;;  %vm98_vm0 = vcmask 1043456   ;;  %vm85_vm1 = vcmask 64512   ;;  %v1892_v3 = vld [vmem:[%s2495_s0 + $0x8] sm:$0xff]   ;;  %v2021_v5 = vmov 0.0  }
  0x1d   :  { %v1891_v1 = vld [vmem:[%s2495_s0] sm:$0xff]   ;;  %1881 = vmatprep.subr.msk.bf16.mxu0 %vm98_vm0, %v57_v0  ;;  %v100_v2 = vsel %vm98_vm0, %v57_v0, 0  ;;  %1775 = vmatprep.subr.bf16.mxu1 %v2021_v5  ;;  %vm2022_vm2 = vmmov 0   ;;  %v2023_v7 = vmov 0   ;;  %vm167_vm3 = vcmask 261120   ;;  %s2024_s15 = smov 104  }
  0x1e   :  { %1766 = vmatpush3.bf16.msra.mxu0 %v100_v2  ;;  %1767 = vmatprep.mubr.msk.bf16.mxu0 %vm85_vm1, %v1891_v1  ;;  %v176_v4 = vld [vmem:[%s2497_s2] sm:$0xf]  ;;  %s2025_s16 = smov 8   ;;  %s2026_s17 = smov 112   ;;  %v1893_v54 = vld [vmem:[%s2495_s0 + $0x10] sm:$0xff]   ;;  %v1894_v55 = vld [vmem:[%s2495_s0 + $0x18] sm:$0xff]  }
  0x1f   :  { %v2085_v6 = vsel %vm98_vm0, %v176_v4, 0  ;;  %1787 = vmatprep.subr.bf16.mxu0 %v2021_v5  ;;  %1777 = vmatprep.mubr.msk.bf16.mxu1 %vm2022_vm2, %v2021_v5  ;;  %v2103_v8 = vld [vmem:[%s2498_s3] ss:$0 sm:$0xff]  ;;  %s1693_s25 = sld [smem:[#allocation4 + $0x81]]  ;;  %s1501_s28 = sld [smem:[#allocation4]] }
  0x20   :  { %1776 = vmatpush3.bf16.msra.mxu1 %v2085_v6  ;;  %s1694_s26 = sld [smem:[#allocation4 + $0x101]]  ;;  %s1689_s29 = sld [smem:[#allocation4 + $0x80]] }
  0x21   :  { %1768 = vmatmul.mubr.msk.bf16.vlgmr.msra.gmra.mrb[0].mxu0 %vm85_vm1, %v1892_v3  ;;  %1781 = vmatprep.subr.bf16.mxu1 %v2021_v5  ;;  %s1695_s27 = sld [smem:[#allocation4 + $0x181]]  ;;  %s1690_s4 = sld [smem:[#allocation4 + $0x100]] }
  0x22   :  { %1788 = vmatpush3.bf16.msra.mxu0 %v2085_v6  ;;  %1771 = vmatprep.mubr.msk.bf16.mxu0 %vm85_vm1, %v1893_v54  ;;  %s1691_s5 = sld [smem:[#allocation4 + $0x180]]  ;;  %s2394_s30 = sld [smem:[#allocation4 + $0x2]] }
  0x23   :  { %1778 = vmatmul.mubr.bf16.vlgmr.msra.gmra.mrb[0].mxu1 %v2023_v7  ;;  %1799 = vmatprep.subr.bf16.mxu0 %v2021_v5  ;;  %s2396_s7 = sld [smem:[#allocation4 + $0x82]]  ;;  %s2402_s10 = sld [smem:[#allocation4 + $0x3]] }
  0x24   :  { %1782 = vmatpush3.bf16.msra.mxu1 %v2085_v6  ;;  %1783 = vmatprep.mubr.msk.bf16.mxu1 %vm2022_vm2, %v2021_v5  ;;  %s2398_s8 = sld [smem:[#allocation4 + $0x102]]  ;;  %s2404_s11 = sld [smem:[#allocation4 + $0x83]] }
  0x25   :  { %1793 = vmatprep.subr.bf16.mxu1 %v2021_v5  ;;  %s2400_s9 = sld [smem:[#allocation4 + $0x182]]  ;;  %s2406_s12 = sld [smem:[#allocation4 + $0x103]] }
  0x26   :  { %s2408_s13 = sld [smem:[#allocation4 + $0x183]]  ;;  %s2412_s14 = sld [smem:[#allocation4 + $0x4]] }
  0x27   :  { %s2422_s18 = sld [smem:[#allocation4 + $0x5]]  ;;  %s2434_s0 = sld [smem:[#allocation4 + $0x6]] }
  0x28   :  { %s2424_s19 = sld [smem:[#allocation4 + $0x85]]  ;;  %s2436_s22 = sld [smem:[#allocation4 + $0x86]] }
  0x29   :  { %1772 = vmatmul.mubr.msk.bf16.gmra.mrb[4].mxu0 %vm85_vm1, %v1894_v55  ;;  %s2426_s20 = sld [smem:[#allocation4 + $0x105]]  ;;  %s2444_s23 = sld [smem:[#allocation4 + $0x186]] }
  0x2a   :  { %1789 = vmatprep.mubr.msk.bf16.mxu0 %vm2022_vm2, %v2021_v5  ;;  %s2428_s21 = sld [smem:[#allocation4 + $0x185]]  ;;  %s2452_s24 = sld [smem:[#allocation4 + $0x87]] }
  0xf4   :  { %v1769_v9 = vpop.f32.mrb[0].mxu0 }
  0xf5   :  { %v145_v10 = vadd.f32 %v1769_v9, %v2103_v8  ;;  %v136_v11 = vpop.f32.mrb[1].mxu0 }
  0xf6   :  { %v137_v12 = vadd.f32 %v2103_v8, %v136_v11  ;;  %v1770_v13 = vpop.f32.mrb[2].mxu0  ;;  %v218_v14 = vpop.f32.mrb[0].mxu1 }
  0xf7   :  { %170 = vst.msk [vmem:[#allocation3 + $0x10] sm:$0xff] %vm167_vm3, %v145_v10  ;;  %v148_v15 = vadd.f32 %v1770_v13, %v2103_v8  ;;  %v139_v16 = vpop.f32.mrb[3].mxu0  ;;  %v1779_v17 = vpop.f32.mrb[1].mxu1 }
  0xf8   :  { %168 = vst.msk [vmem:[#allocation3] sm:$0xff] %vm167_vm3, %v137_v12  ;;  %v140_v18 = vadd.f32 %v2103_v8, %v139_v16  ;;  %v221_v19 = vpop.f32.mrb[2].mxu1 }
  0xf9   :  { %171 = vst.msk [vmem:[#allocation3 + $0x18] sm:$0xff] %vm167_vm3, %v148_v15  ;;  %v1780_v20 = vpop.f32.mrb[3].mxu1 }
  0xfa   :  { %169 = vst.msk [vmem:[#allocation3 + $0x8] sm:$0xff] %vm167_vm3, %v140_v18 }
  0xfc   :  { %v1773_v60 = vpop.f32.mrb[4].mxu0 }
  0xfd   :  { %v161_v61 = vadd.f32 %v1773_v60, %v2103_v8  ;;  %v152_v62 = vpop.f32.mrb[5].mxu0 }
  0xfe   :  { %v153_v63 = vadd.f32 %v2103_v8, %v152_v62  ;;  %v1774_v0 = vpop.f32.mrb[6].mxu0  ;;  %v328_v9 = vld [vmem:[#allocation3 + $0x10] sm:$0xff] }
  0xff   :  { %v177_v21 = vld [vmem:[#allocation3] sm:$0xff]  ;;  %174 = vst.msk [vmem:[#allocation3 + $0x30] sm:$0xff] %vm167_vm3, %v161_v61  ;;  %v164_v1 = vadd.f32 %v1774_v0, %v2103_v8  ;;  %v155_v2 = vpop.f32.mrb[7].mxu0 }
 0x100   :  { %v224_v22 = vadd.f32 %v218_v14, %v177_v21  ;;  %172 = vst.msk [vmem:[#allocation3 + $0x20] sm:$0xff] %vm167_vm3, %v153_v63  ;;  %v156_v3 = vadd.f32 %v2103_v8, %v155_v2 }
 0x101   :  { %v252_v38 = vld [vmem:[#allocation3 + $0x8] sm:$0xff]  ;;  %175 = vst.msk [vmem:[#allocation3 + $0x38] sm:$0xff] %vm167_vm3, %v164_v1 }
 0x102   :  { %1895 = vtanh.f32 %v224_v22  ;;  %v225_v24 = vmul.f32 0.5, %v224_v22  ;;  %173 = vst.msk [vmem:[#allocation3 + $0x28] sm:$0xff] %vm167_vm3, %v156_v3 }
 0x104   :  { %1897 = vtanh.f32 %v225_v24 }
 0x10c   :  { %v1896_v23 = vpop.eup %1895 }
 0x10d   :  { %232 = vrot.lane.b32.xlu0 %v1896_v23, %s2024_s15 }
 0x10e   :  { %v1898_v25 = vpop.eup %1897 }
 0x10f   :  { %v227_v26 = vmul.f32 0.5, %v1898_v25 }
 0x111   :  { %v228_v27 = vadd.f32 0.5, %v227_v26 }
 0x113   :  { %v230_v30 = vmul.f32 0.0, %v228_v27 }
 0x17f   :  { %v233_v28 = vpop.permute.xlu0 %232 }
 0x180   :  { %v235_v29 = vmul.f32 %v233_v28, %v228_v27 }
 0x182   :  { %237 = vrot.lane.b32.xlu0 %v235_v29, %s2025_s16  ;;  %v404_v29 = vld [vmem:[#allocation3 + $0x18] sm:$0xff] }
 0x1f4   :  { %v238_v31 = vpop.permute.xlu0 %237 }
 0x1f5   :  { %v240_v32 = vadd.f32 %v238_v31, %v230_v30 }
 0x1f7   :  { %1899 = vtanh.f32 %v240_v32 }
 0x201   :  { %v1900_v33 = vpop.eup %1899 }
 0x202   :  { %243 = vrot.lane.b32.xlu1 %v1900_v33, %s2025_s16 }
 0x274   :  { %v244_v34 = vpop.permute.xlu1 %243 }
 0x275   :  { %v2116_v35 = vmul.f32 %v244_v34, %v228_v27 }
 0x277   :  { %v253_v36 = vpack.c.bf16 %v2116_v35, %v2116_v35 }
 0x279   :  { %255 = vrot.lane.b32.xlu1 %v253_v36, %s2026_s17 }
 0x2eb   :  { %v256_v37 = vpop.permute.xlu1 %255 }
 0x2ec   :  { %1784 = vmatmul.mubr.msk.bf16.vlgmr.msra.gmra.mrb[4].mxu1 %vm85_vm1, %v256_v37 }
 0x2ed   :  { %1794 = vmatpush3.bf16.msra.mxu1 %v2085_v6  ;;  %1795 = vmatprep.mubr.msk.bf16.mxu1 %vm2022_vm2, %v2021_v5 }
 0x2ee   :  { %1805 = vmatprep.subr.bf16.mxu1 %v2021_v5 }
 0x3bf   :  { %v294_v39 = vpop.f32.mrb[4].mxu1 }
 0x3c0   :  { %v300_v40 = vadd.f32 %v294_v39, %v252_v38  ;;  %v1785_v41 = vpop.f32.mrb[5].mxu1 }
 0x3c1   :  { %v297_v42 = vpop.f32.mrb[6].mxu1 }
 0x3c2   :  { %1901 = vtanh.f32 %v300_v40  ;;  %v1786_v43 = vpop.f32.mrb[7].mxu1  ;;  %v301_v45 = vmul.f32 0.5, %v300_v40 }
 0x3c4   :  { %1903 = vtanh.f32 %v301_v45 }
 0x3cc   :  { %v1902_v44 = vpop.eup %1901 }
 0x3cd   :  { %308 = vrot.lane.b32.xlu0 %v1902_v44, %s2024_s15 }
 0x3ce   :  { %v1904_v46 = vpop.eup %1903 }
 0x3cf   :  { %v303_v47 = vmul.f32 0.5, %v1904_v46 }
 0x3d1   :  { %v304_v48 = vadd.f32 0.5, %v303_v47 }
 0x3d3   :  { %v306_v51 = vmul.f32 %v304_v48, %v240_v32 }
 0x43f   :  { %v309_v49 = vpop.permute.xlu0 %308 }
 0x440   :  { %v311_v50 = vmul.f32 %v309_v49, %v304_v48 }
 0x442   :  { %313 = vrot.lane.b32.xlu1 %v311_v50, %s2025_s16 }
 0x4b4   :  { %v314_v52 = vpop.permute.xlu1 %313 }
 0x4b5   :  { %v316_v53 = vadd.f32 %v314_v52, %v306_v51  ;;  %v480_v51 = vld [vmem:[#allocation3 + $0x20] sm:$0xff] }
 0x4b7   :  { %1905 = vtanh.f32 %v316_v53 }
 0x4c1   :  { %v1906_v56 = vpop.eup %1905 }
 0x4c2   :  { %319 = vrot.lane.b32.xlu0 %v1906_v56, %s2025_s16 }
 0x534   :  { %v320_v57 = vpop.permute.xlu0 %319 }
 0x535   :  { %v2139_v58 = vmul.f32 %v320_v57, %v304_v48 }
 0x537   :  { %v329_v59 = vpack.c.bf16 %v2139_v58, %v2139_v58 }
 0x539   :  { %331 = vrot.lane.b32.xlu1 %v329_v59, %s2026_s17 }
 0x5ab   :  { %v332_v4 = vpop.permute.xlu1 %331 }
 0x5ac   :  { %1790 = vmatmul.mubr.msk.bf16.vlgmr.msra.gmra.mrb[8].mxu0 %vm85_vm1, %v332_v4 }
 0x5ad   :  { %1800 = vmatpush3.bf16.msra.mxu0 %v2085_v6  ;;  %1801 = vmatprep.mubr.msk.bf16.mxu0 %vm2022_vm2, %v2021_v5 }
 0x5ae   :  { %1811 = vmatprep.subr.bf16.mxu0 %v2021_v5 }
 0x67f   :  { %v370_v10 = vpop.f32.mrb[8].mxu0 }
 0x680   :  { %v376_v11 = vadd.f32 %v370_v10, %v328_v9  ;;  %v1791_v12 = vpop.f32.mrb[9].mxu0 }
 0x681   :  { %v373_v13 = vpop.f32.mrb[10].mxu0 }
 0x682   :  { %1907 = vtanh.f32 %v376_v11  ;;  %v1792_v8 = vpop.f32.mrb[11].mxu0  ;;  %v377_v15 = vmul.f32 0.5, %v376_v11  ;;  %v556_v13 = vld [vmem:[#allocation3 + $0x28] sm:$0xff] }
 0x684   :  { %1909 = vtanh.f32 %v377_v15 }
 0x68c   :  { %v1908_v14 = vpop.eup %1907 }
 0x68d   :  { %384 = vrot.lane.b32.xlu0 %v1908_v14, %s2024_s15 }
 0x68e   :  { %v1910_v16 = vpop.eup %1909 }
 0x68f   :  { %v379_v17 = vmul.f32 0.5, %v1910_v16 }
 0x691   :  { %v380_v18 = vadd.f32 0.5, %v379_v17 }
 0x693   :  { %v382_v21 = vmul.f32 %v380_v18, %v316_v53 }
 0x6ff   :  { %v385_v19 = vpop.permute.xlu0 %384 }
 0x700   :  { %v387_v20 = vmul.f32 %v385_v19, %v380_v18 }
 0x702   :  { %389 = vrot.lane.b32.xlu1 %v387_v20, %s2025_s16 }
 0x774   :  { %v390_v22 = vpop.permute.xlu1 %389 }
 0x775   :  { %v392_v23 = vadd.f32 %v390_v22, %v382_v21 }
 0x777   :  { %1911 = vtanh.f32 %v392_v23 }
 0x781   :  { %v1912_v24 = vpop.eup %1911 }
 0x782   :  { %395 = vrot.lane.b32.xlu0 %v1912_v24, %s2025_s16 }
 0x7f4   :  { %v396_v25 = vpop.permute.xlu0 %395 }
 0x7f5   :  { %v2160_v26 = vmul.f32 %v396_v25, %v380_v18 }
 0x7f7   :  { %v405_v27 = vpack.c.bf16 %v2160_v26, %v2160_v26 }
 0x7f9   :  { %407 = vrot.lane.b32.xlu1 %v405_v27, %s2026_s17 }
 0x86b   :  { %v408_v28 = vpop.permute.xlu1 %407 }
 0x86c   :  { %1796 = vmatmul.mubr.msk.bf16.vlgmr.msra.gmra.mrb[8].mxu1 %vm85_vm1, %v408_v28 }
 0x86d   :  { %1806 = vmatpush3.bf16.msra.mxu1 %v2085_v6  ;;  %1807 = vmatprep.mubr.msk.bf16.mxu1 %vm2022_vm2, %v2021_v5 }
 0x86e   :  { %1817 = vmatprep.subr.bf16.mxu1 %v2021_v5 }
 0x93f   :  { %v446_v30 = vpop.f32.mrb[8].mxu1 }
 0x940   :  { %v452_v31 = vadd.f32 %v446_v30, %v404_v29  ;;  %v1797_v32 = vpop.f32.mrb[9].mxu1 }
 0x941   :  { %v449_v33 = vpop.f32.mrb[10].mxu1 }
 0x942   :  { %1913 = vtanh.f32 %v452_v31  ;;  %v1798_v34 = vpop.f32.mrb[11].mxu1  ;;  %v453_v37 = vmul.f32 0.5, %v452_v31  ;;  %v632_v33 = vld [vmem:[#allocation3 + $0x30] sm:$0xff] }
 0x944   :  { %1915 = vtanh.f32 %v453_v37 }
 0x94c   :  { %v1914_v36 = vpop.eup %1913 }
 0x94d   :  { %460 = vrot.lane.b32.xlu0 %v1914_v36, %s2024_s15 }
 0x94e   :  { %v1916_v38 = vpop.eup %1915 }
 0x94f   :  { %v455_v39 = vmul.f32 0.5, %v1916_v38 }
 0x951   :  { %v456_v40 = vadd.f32 0.5, %v455_v39 }
 0x953   :  { %v458_v43 = vmul.f32 %v456_v40, %v392_v23 }
 0x9bf   :  { %v461_v41 = vpop.permute.xlu0 %460 }
 0x9c0   :  { %v463_v42 = vmul.f32 %v461_v41, %v456_v40 }
 0x9c2   :  { %465 = vrot.lane.b32.xlu1 %v463_v42, %s2025_s16 }
 0xa34   :  { %v466_v44 = vpop.permute.xlu1 %465 }
 0xa35   :  { %v468_v45 = vadd.f32 %v466_v44, %v458_v43 }
 0xa37   :  { %1917 = vtanh.f32 %v468_v45 }
 0xa41   :  { %v1918_v46 = vpop.eup %1917 }
 0xa42   :  { %471 = vrot.lane.b32.xlu0 %v1918_v46, %s2025_s16 }
 0xab4   :  { %v472_v47 = vpop.permute.xlu0 %471 }
 0xab5   :  { %v2173_v48 = vmul.f32 %v472_v47, %v456_v40 }
 0xab7   :  { %v481_v49 = vpack.c.bf16 %v2173_v48, %v2173_v48 }
 0xab9   :  { %483 = vrot.lane.b32.xlu1 %v481_v49, %s2026_s17 }
 0xb2b   :  { %v484_v50 = vpop.permute.xlu1 %483 }
 0xb2c   :  { %1802 = vmatmul.mubr.msk.bf16.vlgmr.msra.gmra.mrb[12].mxu0 %vm85_vm1, %v484_v50 }
 0xb2d   :  { %1812 = vmatpush3.bf16.msra.mxu0 %v2085_v6  ;;  %1813 = vmatprep.mubr.msk.bf16.mxu0 %vm2022_vm2, %v2021_v5 }
 0xbff   :  { %v522_v52 = vpop.f32.mrb[12].mxu0 }
 0xc00   :  { %v528_v53 = vadd.f32 %v522_v52, %v480_v51  ;;  %v1803_v54 = vpop.f32.mrb[13].mxu0 }
 0xc01   :  { %v525_v55 = vpop.f32.mrb[14].mxu0 }
 0xc02   :  { %1919 = vtanh.f32 %v528_v53  ;;  %v1804_v56 = vpop.f32.mrb[15].mxu0  ;;  %v529_v59 = vmul.f32 0.5, %v528_v53  ;;  %v1674_v53 = vld [vmem:[%s2496_s1 + $0x4] sm:$0xf]  ;;  %s2442_s1 = sld [smem:[#allocation4 + $0x106]] }
 0xc03   :  { %1882 = vmatprep.subr.msk.bf16.mxu0 %vm98_vm0, %v1674_v53 }
 0xc04   :  { %1921 = vtanh.f32 %v529_v59 }
 0xc0c   :  { %v1920_v57 = vpop.eup %1919 }
 0xc0d   :  { %536 = vrot.lane.b32.xlu0 %v1920_v57, %s2024_s15 }
 0xc0e   :  { %v1922_v60 = vpop.eup %1921 }
 0xc0f   :  { %v531_v61 = vmul.f32 0.5, %v1922_v60 }
 0xc11   :  { %v532_v62 = vadd.f32 0.5, %v531_v61 }
 0xc13   :  { %v534_v1 = vmul.f32 %v532_v62, %v468_v45 }
 0xc7f   :  { %v537_v63 = vpop.permute.xlu0 %536 }
 0xc80   :  { %v539_v0 = vmul.f32 %v537_v63, %v532_v62  ;;  %v1681_v63 = vld [vmem:[%s2497_s2 + $0x4] sm:$0xf]  ;;  %s2450_s2 = sld [smem:[#allocation4 + $0x7]] }
 0xc82   :  { %541 = vrot.lane.b32.xlu1 %v539_v0, %s2025_s16 }
 0xcf4   :  { %v542_v2 = vpop.permute.xlu1 %541 }
 0xcf5   :  { %v544_v3 = vadd.f32 %v542_v2, %v534_v1  ;;  %v2239_v1 = vsel %vm98_vm0, %v1681_v63, 0 }
 0xcf7   :  { %1923 = vtanh.f32 %v544_v3 }
 0xd01   :  { %v1924_v4 = vpop.eup %1923 }
 0xd02   :  { %547 = vrot.lane.b32.xlu0 %v1924_v4, %s2025_s16 }
 0xd74   :  { %v548_v9 = vpop.permute.xlu0 %547 }
 0xd75   :  { %v2185_v10 = vmul.f32 %v548_v9, %v532_v62 }
 0xd77   :  { %v557_v11 = vpack.c.bf16 %v2185_v10, %v2185_v10 }
 0xd79   :  { %559 = vrot.lane.b32.xlu1 %v557_v11, %s2026_s17 }
 0xdeb   :  { %v560_v12 = vpop.permute.xlu1 %559 }
 0xdec   :  { %1808 = vmatmul.mubr.msk.bf16.vlgmr.msra.gmra.mrb[12].mxu1 %vm85_vm1, %v560_v12 }
 0xded   :  { %1818 = vmatpush3.bf16.msra.mxu1 %v2085_v6  ;;  %1819 = vmatprep.mubr.msk.bf16.mxu1 %vm2022_vm2, %v2021_v5 }
 0xdee   :  { %1833 = vmatprep.subr.bf16.mxu1 %v2021_v5 }
 0xebf   :  { %v598_v8 = vpop.f32.mrb[12].mxu1 }
 0xec0   :  { %v604_v14 = vadd.f32 %v598_v8, %v556_v13  ;;  %v1809_v15 = vpop.f32.mrb[13].mxu1 }
 0xec1   :  { %v601_v16 = vpop.f32.mrb[14].mxu1 }
 0xec2   :  { %1925 = vtanh.f32 %v604_v14  ;;  %v1810_v17 = vpop.f32.mrb[15].mxu1  ;;  %v605_v19 = vmul.f32 0.5, %v604_v14 }
 0xec4   :  { %1927 = vtanh.f32 %v605_v19 }
 0xecc   :  { %v1926_v18 = vpop.eup %1925 }
 0xecd   :  { %612 = vrot.lane.b32.xlu0 %v1926_v18, %s2024_s15 }
 0xece   :  { %v1928_v20 = vpop.eup %1927 }
 0xecf   :  { %v607_v21 = vmul.f32 0.5, %v1928_v20 }
 0xed1   :  { %v608_v6 = vadd.f32 0.5, %v607_v21 }
 0xed3   :  { %v610_v24 = vmul.f32 %v608_v6, %v544_v3  ;;  %v2256_v3 = vld [vmem:[%s2498_s3 + $0x1] ss:$0 sm:$0xff]  ;;  %s1692_s3 = sld [smem:[#allocation4 + $0x1]] }
 0xf3f   :  { %v613_v22 = vpop.permute.xlu0 %612 }
 0xf40   :  { %v615_v23 = vmul.f32 %v613_v22, %v608_v6 }
 0xf42   :  { %617 = vrot.lane.b32.xlu1 %v615_v23, %s2025_s16 }
 0xfb4   :  { %v618_v25 = vpop.permute.xlu1 %617 }
 0xfb5   :  { %v620_v27 = vadd.f32 %v618_v25, %v610_v24 }
 0xfb7   :  { %1929 = vtanh.f32 %v620_v27 }
 0xfc1   :  { %v1930_v28 = vpop.eup %1929 }
 0xfc2   :  { %623 = vrot.lane.b32.xlu0 %v1930_v28, %s2025_s16 }
0x1034   :  { %v624_v29 = vpop.permute.xlu0 %623 }
0x1035   :  { %v2198_v30 = vmul.f32 %v624_v29, %v608_v6 }
0x1037   :  { %v633_v31 = vpack.c.bf16 %v2198_v30, %v2198_v30 }
0x1039   :  { %635 = vrot.lane.b32.xlu1 %v633_v31, %s2026_s17 }
0x10ab   :  { %v636_v32 = vpop.permute.xlu1 %635 }
0x10ac   :  { %1814 = vmatmul.mubr.msk.bf16.vlgmr.msra.gmra.mrb[16].mxu0 %vm85_vm1, %v636_v32 }
0x117f   :  { %v674_v34 = vpop.f32.mrb[16].mxu0 }
0x1180   :  { %v680_v36 = vadd.f32 %v674_v34, %v632_v33  ;;  %v1815_v37 = vpop.f32.mrb[17].mxu0 }
0x1181   :  { %v677_v38 = vpop.f32.mrb[18].mxu0  ;;  %v708_v37 = vld [vmem:[#allocation3 + $0x38] sm:$0xff] }
0x1182   :  { %1931 = vtanh.f32 %v680_v36  ;;  %v1816_v39 = vpop.f32.mrb[19].mxu0  ;;  %v681_v41 = vmul.f32 0.5, %v680_v36 }
0x1184   :  { %1933 = vtanh.f32 %v681_v41 }
0x118c   :  { %v1932_v40 = vpop.eup %1931 }
0x118d   :  { %688 = vrot.lane.b32.xlu0 %v1932_v40, %s2024_s15 }
0x118e   :  { %v1934_v42 = vpop.eup %1933 }
0x118f   :  { %v683_v43 = vmul.f32 0.5, %v1934_v42 }
0x1191   :  { %v684_v44 = vadd.f32 0.5, %v683_v43 }
0x1193   :  { %v686_v47 = vmul.f32 %v684_v44, %v620_v27 }
0x11ff   :  { %v689_v45 = vpop.permute.xlu0 %688 }
0x1200   :  { %v691_v46 = vmul.f32 %v689_v45, %v684_v44 }
0x1202   :  { %693 = vrot.lane.b32.xlu1 %v691_v46, %s2025_s16 }
0x1206   :  { %248 = vrot.lane.b32.xlu1 %v2116_v35, %s2026_s17 }
0x120a   :  { %400 = vrot.lane.b32.xlu1 %v2160_v26, %s2026_s17  ;;  %v819_v26 = vsel %vm98_vm0, %v1674_v53, 0 }
0x120b   :  { %1824 = vmatpush3.bf16.msra.mxu0 %v819_v26 }
0x120c   :  { %1845 = vmatprep.subr.bf16.mxu0 %v2021_v5 }
0x1274   :  { %v694_v49 = vpop.permute.xlu1 %693 }
0x1275   :  { %v2210_v50 = vadd.f32 %v694_v49, %v686_v47 }
0x1277   :  { %1935 = vtanh.f32 %v2210_v50 }
0x1278   :  { %v249_v51 = vpop.permute.xlu1 %248 }
0x1279   :  { %251 = vst.msk [vmem:[#allocation2] sm:$0xff] %vm85_vm1, %v249_v51 }
0x127c   :  { %v401_v52 = vpop.permute.xlu1 %400 }
0x127d   :  { %403 = vst.msk [vmem:[#allocation2 + $0x10] sm:$0xff] %vm85_vm1, %v401_v52 }
0x1280   :  { %v784_v60 = vld [vmem:[#allocation2] sm:$0xff] }
0x1281   :  { %v1936_v35 = vpop.eup %1935 }
0x1282   :  { %699 = vrot.lane.b32.xlu0 %v1936_v35, %s2025_s16 }
0x1286   :  { %324 = vrot.lane.b32.xlu0 %v2139_v58, %s2026_s17 }
0x128a   :  { %476 = vrot.lane.b32.xlu0 %v2173_v48, %s2026_s17  ;;  %v786_v48 = vld [vmem:[#allocation2 + $0x10] sm:$0xff] }
0x12f4   :  { %v700_v54 = vpop.permute.xlu0 %699 }
0x12f5   :  { %v2226_v55 = vmul.f32 %v700_v54, %v684_v44 }
0x12f7   :  { %v709_v56 = vpack.c.bf16 %v2226_v55, %v2226_v55 }
0x12f8   :  { %v325_v57 = vpop.permute.xlu0 %324 }
0x12f9   :  { %327 = vst.msk [vmem:[#allocation2 + $0x8] sm:$0xff] %vm85_vm1, %v325_v57  ;;  %711 = vrot.lane.b32.xlu1 %v709_v56, %s2026_s17 }
0x12fc   :  { %v477_v59 = vpop.permute.xlu0 %476 }
0x12fd   :  { %479 = vst.msk [vmem:[#allocation2 + $0x18] sm:$0xff] %vm85_vm1, %v477_v59 }
0x1300   :  { %v785_v61 = vld [vmem:[#allocation2 + $0x8] sm:$0xff] }
0x1301   :  { %v792_v58 = vpack.c.bf16 %v785_v61, %v784_v60 }
0x1303   :  { %1825 = vmatprep.mubr.msk.bf16.mxu0 %vm85_vm1, %v792_v58 }
0x1304   :  { %v787_v62 = vld [vmem:[#allocation2 + $0x18] sm:$0xff] }
0x1305   :  { %v793_v0 = vpack.c.bf16 %v787_v62, %v786_v48 }
0x1307   :  { %1826 = vmatmul.mubr.msk.bf16.vlgmr.msra.gmra.mrb[20].mxu0 %vm85_vm1, %v793_v0 }
0x1308   :  { %1846 = vmatpush3.bf16.msra.mxu0 %v2239_v1 }
0x1309   :  { %1857 = vmatprep.subr.bf16.mxu0 %v2021_v5 }
0x136b   :  { %v712_v2 = vpop.permute.xlu1 %711 }
0x136c   :  { %1820 = vmatmul.mubr.msk.bf16.vlgmr.msra.gmra.mrb[16].mxu1 %vm85_vm1, %v712_v2 }
0x136d   :  { %1834 = vmatpush3.bf16.msra.mxu1 %v2239_v1  ;;  %1835 = vmatprep.mubr.msk.bf16.mxu1 %vm2022_vm2, %v2021_v5 }
0x136e   :  { %1839 = vmatprep.subr.bf16.mxu1 %v2021_v5 }
0x1374   :  { %1836 = vmatmul.mubr.bf16.vlgmr.msra.gmra.mrb[20].mxu1 %v2023_v7 }
0x1375   :  { %1840 = vmatpush3.bf16.msra.mxu1 %v2239_v1  ;;  %1841 = vmatprep.mubr.msk.bf16.mxu1 %vm2022_vm2, %v2021_v5 }
0x1376   :  { %1851 = vmatprep.subr.bf16.mxu1 %v2021_v5 }
0x13da   :  { %v1827_v4 = vpop.f32.mrb[20].mxu0 }
0x13db   :  { %v864_v9 = vadd.f32 %v1827_v4, %v2256_v3  ;;  %v855_v11 = vpop.f32.mrb[21].mxu0 }
0x13dc   :  { %v856_v12 = vadd.f32 %v2256_v3, %v855_v11  ;;  %v1828_v13 = vpop.f32.mrb[22].mxu0 }
0x13dd   :  { %888 = vst.msk [vmem:[#allocation3 + $0x10] sm:$0xff] %vm167_vm3, %v864_v9  ;;  %v867_v7 = vadd.f32 %v1828_v13, %v2256_v3  ;;  %v858_v8 = vpop.f32.mrb[23].mxu0 }
0x13de   :  { %886 = vst.msk [vmem:[#allocation3] sm:$0xff] %vm167_vm3, %v856_v12  ;;  %v859_v14 = vadd.f32 %v2256_v3, %v858_v8 }
0x13df   :  { %889 = vst.msk [vmem:[#allocation3 + $0x18] sm:$0xff] %vm167_vm3, %v867_v7 }
0x13e0   :  { %887 = vst.msk [vmem:[#allocation3 + $0x8] sm:$0xff] %vm167_vm3, %v859_v14 }
0x13e5   :  { %v896_v19 = vld [vmem:[#allocation3] sm:$0xff] }
0x13e7   :  { %v968_v59 = vld [vmem:[#allocation3 + $0x8] sm:$0xff] }
0x143f   :  { %v750_v15 = vpop.f32.mrb[16].mxu1 }
0x1440   :  { %v1821_v16 = vpop.f32.mrb[17].mxu1  ;;  %v756_v38 = vadd.f32 %v750_v15, %v708_v37 }
0x1441   :  { %v753_v17 = vpop.f32.mrb[18].mxu1 }
0x1442   :  { %v1822_v18 = vpop.f32.mrb[19].mxu1  ;;  %v757_v41 = vmul.f32 0.5, %v756_v38 }
0x1447   :  { %v934_v20 = vpop.f32.mrb[20].mxu1 }
0x1448   :  { %v940_v21 = vadd.f32 %v934_v20, %v896_v19  ;;  %v1837_v6 = vpop.f32.mrb[21].mxu1 }
0x1449   :  { %v937_v22 = vpop.f32.mrb[22].mxu1 }
0x144a   :  { %1937 = vtanh.f32 %v940_v21  ;;  %v1838_v23 = vpop.f32.mrb[23].mxu1  ;;  %v941_v25 = vmul.f32 0.5, %v940_v21 }
0x144c   :  { %1939 = vtanh.f32 %v941_v25 }
0x1454   :  { %v1938_v24 = vpop.eup %1937 }
0x1455   :  { %948 = vrot.lane.b32.xlu0 %v1938_v24, %s2024_s15 }
0x1456   :  { %v1940_v27 = vpop.eup %1939 }
0x1457   :  { %v943_v28 = vmul.f32 0.5, %v1940_v27 }
0x1459   :  { %v944_v29 = vadd.f32 0.5, %v943_v28 }
0x145b   :  { %v946_v33 = vmul.f32 0.0, %v944_v29 }
0x14c7   :  { %v949_v31 = vpop.permute.xlu0 %948 }
0x14c8   :  { %v951_v32 = vmul.f32 %v949_v31, %v944_v29 }
0x14ca   :  { %953 = vrot.lane.b32.xlu1 %v951_v32, %s2025_s16 }
0x153c   :  { %v954_v34 = vpop.permute.xlu1 %953 }
0x153d   :  { %v956_v36 = vadd.f32 %v954_v34, %v946_v33  ;;  %v1044_v34 = vld [vmem:[#allocation3 + $0x10] sm:$0xff] }
0x153f   :  { %1941 = vtanh.f32 %v956_v36 }
0x1540   :  { %1943 = vtanh.f32 %v756_v38 }
0x1541   :  { %1945 = vtanh.f32 %v757_v41 }
0x1549   :  { %v1942_v39 = vpop.eup %1941 }
0x154a   :  { %959 = vrot.lane.b32.xlu0 %v1942_v39, %s2025_s16  ;;  %v1944_v40 = vpop.eup %1943 }
0x154b   :  { %v1946_v42 = vpop.eup %1945 }
0x154c   :  { %v759_v43 = vmul.f32 0.5, %v1946_v42 }
0x154e   :  { %764 = vrot.lane.b32.xlu0 %v1944_v40, %s2024_s15  ;;  %v760_v47 = vadd.f32 0.5, %v759_v43 }
0x1550   :  { %v762_v53 = vmul.f32 %v760_v47, %v2210_v50 }
0x15bc   :  { %v960_v44 = vpop.permute.xlu0 %959 }
0x15bd   :  { %v2270_v45 = vmul.f32 %v960_v44, %v944_v29 }
0x15bf   :  { %v969_v46 = vpack.c.bf16 %v2270_v45, %v2270_v45 }
0x15c0   :  { %v765_v49 = vpop.permute.xlu0 %764 }
0x15c1   :  { %v767_v51 = vmul.f32 %v765_v49, %v760_v47  ;;  %971 = vrot.lane.b32.xlu1 %v969_v46, %s2026_s17 }
0x15c3   :  { %769 = vrot.lane.b32.xlu0 %v767_v51, %s2025_s16 }
0x1633   :  { %v972_v52 = vpop.permute.xlu1 %971 }
0x1634   :  { %1842 = vmatmul.mubr.msk.bf16.vlgmr.msra.gmra.mrb[24].mxu1 %vm85_vm1, %v972_v52 }
0x1635   :  { %v770_v35 = vpop.permute.xlu0 %769  ;;  %1852 = vmatpush3.bf16.msra.mxu1 %v2239_v1  ;;  %1853 = vmatprep.mubr.msk.bf16.mxu1 %vm2022_vm2, %v2021_v5 }
0x1636   :  { %v772_v26 = vadd.f32 %v770_v35, %v762_v53  ;;  %1863 = vmatprep.subr.bf16.mxu1 %v2021_v5 }
0x1638   :  { %1947 = vtanh.f32 %v772_v26 }
0x1642   :  { %v1948_v54 = vpop.eup %1947 }
0x1643   :  { %775 = vrot.lane.b32.xlu0 %v1948_v54, %s2025_s16 }
0x1647   :  { %552 = vrot.lane.b32.xlu0 %v2185_v10, %s2026_s17 }
0x164b   :  { %704 = vrot.lane.b32.xlu0 %v2226_v55, %s2026_s17 }
0x16b5   :  { %v776_v50 = vpop.permute.xlu0 %775 }
0x16b6   :  { %v778_v8 = vmul.f32 %v776_v50, %v760_v47 }
0x16b9   :  { %v553_v56 = vpop.permute.xlu0 %552 }
0x16ba   :  { %555 = vst.msk [vmem:[#allocation2 + $0x20] sm:$0xff] %vm85_vm1, %v553_v56  ;;  %v1120_v56 = vld [vmem:[#allocation3 + $0x18] sm:$0xff] }
0x16bd   :  { %v705_v57 = vpop.permute.xlu0 %704 }
0x16be   :  { %707 = vst.msk [vmem:[#allocation2 + $0x30] sm:$0xff] %vm85_vm1, %v705_v57 }
0x16c1   :  { %v788_v19 = vld [vmem:[#allocation2 + $0x20] sm:$0xff] }
0x16c5   :  { %v790_v21 = vld [vmem:[#allocation2 + $0x30] sm:$0xff] }
0x1707   :  { %v1010_v60 = vpop.f32.mrb[24].mxu1 }
0x1708   :  { %v1016_v61 = vadd.f32 %v1010_v60, %v968_v59  ;;  %v1843_v58 = vpop.f32.mrb[25].mxu1 }
0x1709   :  { %v1013_v48 = vpop.f32.mrb[26].mxu1 }
0x170a   :  { %1949 = vtanh.f32 %v1016_v61  ;;  %v1844_v62 = vpop.f32.mrb[27].mxu1  ;;  %v1017_v10 = vmul.f32 0.5, %v1016_v61 }
0x170c   :  { %1951 = vtanh.f32 %v1017_v10 }
0x1714   :  { %v1950_v63 = vpop.eup %1949 }
0x1715   :  { %1024 = vrot.lane.b32.xlu1 %v1950_v63, %s2024_s15 }
0x1716   :  { %v1952_v55 = vpop.eup %1951 }
0x1717   :  { %v1019_v0 = vmul.f32 0.5, %v1952_v55 }
0x1719   :  { %v1020_v2 = vadd.f32 0.5, %v1019_v0 }
0x171b   :  { %v1022_v11 = vmul.f32 %v1020_v2, %v956_v36 }
0x1787   :  { %v1025_v4 = vpop.permute.xlu1 %1024 }
0x1788   :  { %v1027_v9 = vmul.f32 %v1025_v4, %v1020_v2 }
0x178a   :  { %1029 = vrot.lane.b32.xlu1 %v1027_v9, %s2025_s16 }
0x17fc   :  { %v1030_v12 = vpop.permute.xlu1 %1029 }
0x17fd   :  { %v1032_v13 = vadd.f32 %v1030_v12, %v1022_v11 }
0x17ff   :  { %1953 = vtanh.f32 %v1032_v13 }
0x1809   :  { %v1954_v7 = vpop.eup %1953 }
0x180a   :  { %1035 = vrot.lane.b32.xlu1 %v1954_v7, %s2025_s16 }
0x180e   :  { %628 = vrot.lane.b32.xlu1 %v2198_v30, %s2026_s17 }
0x1812   :  { %780 = vrot.lane.b32.xlu1 %v778_v8, %s2026_s17 }
0x187c   :  { %v1036_v14 = vpop.permute.xlu1 %1035 }
0x187d   :  { %v2295_v15 = vmul.f32 %v1036_v14, %v1020_v2 }
0x187f   :  { %v1045_v16 = vpack.c.bf16 %v2295_v15, %v2295_v15 }
0x1880   :  { %v629_v17 = vpop.permute.xlu1 %628 }
0x1881   :  { %631 = vst.msk [vmem:[#allocation2 + $0x28] sm:$0xff] %vm85_vm1, %v629_v17  ;;  %1047 = vrot.lane.b32.xlu0 %v1045_v16, %s2026_s17 }
0x1884   :  { %v781_v18 = vpop.permute.xlu1 %780 }
0x1885   :  { %783 = vst.msk [vmem:[#allocation2 + $0x38] sm:$0xff] %vm85_vm1, %v781_v18 }
0x1888   :  { %v789_v20 = vld [vmem:[#allocation2 + $0x28] sm:$0xff] }
0x1889   :  { %v794_v30 = vpack.c.bf16 %v789_v20, %v788_v19 }
0x188b   :  { %1829 = vmatprep.mubr.msk.bf16.mxu0 %vm85_vm1, %v794_v30 }
0x188c   :  { %v791_v6 = vld [vmem:[#allocation2 + $0x38] sm:$0xff] }
0x188d   :  { %v795_v22 = vpack.c.bf16 %v791_v6, %v790_v21 }
0x188f   :  { %1830 = vmatmul.mubr.msk.bf16.gmra.mrb[24].mxu0 %vm85_vm1, %v795_v22 }
0x1890   :  { %1847 = vmatprep.mubr.msk.bf16.mxu0 %vm2022_vm2, %v2021_v5 }
0x18f3   :  { %v1048_v23 = vpop.permute.xlu0 %1047 }
0x18f4   :  { %1848 = vmatmul.mubr.msk.bf16.vlgmr.msra.gmra.mrb[28].mxu0 %vm85_vm1, %v1048_v23 }
0x18f5   :  { %1858 = vmatpush3.bf16.msra.mxu0 %v2239_v1  ;;  %1859 = vmatprep.mubr.msk.bf16.mxu0 %vm2022_vm2, %v2021_v5 }
0x18f6   :  { %1869 = vmatprep.subr.bf16.mxu0 %v2021_v5 }
0x1962   :  { %v1831_v24 = vpop.f32.mrb[24].mxu0 }
0x1963   :  { %v880_v25 = vadd.f32 %v1831_v24, %v2256_v3  ;;  %v871_v27 = vpop.f32.mrb[25].mxu0 }
0x1964   :  { %v872_v28 = vadd.f32 %v2256_v3, %v871_v27  ;;  %v1832_v29 = vpop.f32.mrb[26].mxu0 }
0x1965   :  { %892 = vst.msk [vmem:[#allocation3 + $0x30] sm:$0xff] %vm167_vm3, %v880_v25  ;;  %v883_v31 = vadd.f32 %v1832_v29, %v2256_v3  ;;  %v874_v32 = vpop.f32.mrb[27].mxu0 }
0x1966   :  { %890 = vst.msk [vmem:[#allocation3 + $0x20] sm:$0xff] %vm167_vm3, %v872_v28  ;;  %v875_v33 = vadd.f32 %v2256_v3, %v874_v32 }
0x1967   :  { %893 = vst.msk [vmem:[#allocation3 + $0x38] sm:$0xff] %vm167_vm3, %v883_v31 }
0x1968   :  { %891 = vst.msk [vmem:[#allocation3 + $0x28] sm:$0xff] %vm167_vm3, %v875_v33 }
0x196d   :  { %v1196_v16 = vld [vmem:[#allocation3 + $0x20] sm:$0xff] }
0x19c7   :  { %v1086_v36 = vpop.f32.mrb[28].mxu0 }
0x19c8   :  { %v1092_v37 = vadd.f32 %v1086_v36, %v1044_v34  ;;  %v1849_v38 = vpop.f32.mrb[29].mxu0 }
0x19c9   :  { %v1089_v39 = vpop.f32.mrb[30].mxu0  ;;  %v1272_v38 = vld [vmem:[#allocation3 + $0x28] sm:$0xff] }
0x19ca   :  { %1955 = vtanh.f32 %v1092_v37  ;;  %v1850_v40 = vpop.f32.mrb[31].mxu0  ;;  %v1093_v42 = vmul.f32 0.5, %v1092_v37 }
0x19cc   :  { %1957 = vtanh.f32 %v1093_v42 }
0x19d4   :  { %v1956_v41 = vpop.eup %1955 }
0x19d5   :  { %1100 = vrot.lane.b32.xlu1 %v1956_v41, %s2024_s15 }
0x19d6   :  { %v1958_v43 = vpop.eup %1957 }
0x19d7   :  { %v1095_v44 = vmul.f32 0.5, %v1958_v43 }
0x19d9   :  { %v1096_v46 = vadd.f32 0.5, %v1095_v44 }
0x19db   :  { %v1098_v49 = vmul.f32 %v1096_v46, %v1032_v13 }
0x1a47   :  { %v1101_v3 = vpop.permute.xlu1 %1100 }
0x1a48   :  { %v1103_v47 = vmul.f32 %v1101_v3, %v1096_v46 }
0x1a4a   :  { %1105 = vrot.lane.b32.xlu0 %v1103_v47, %s2025_s16 }
0x1abc   :  { %v1106_v51 = vpop.permute.xlu0 %1105 }
0x1abd   :  { %v1108_v52 = vadd.f32 %v1106_v51, %v1098_v49 }
0x1abf   :  { %1959 = vtanh.f32 %v1108_v52 }
0x1ac9   :  { %v1960_v53 = vpop.eup %1959 }
0x1aca   :  { %1111 = vrot.lane.b32.xlu1 %v1960_v53, %s2025_s16 }
0x1b3c   :  { %v1112_v35 = vpop.permute.xlu1 %1111 }
0x1b3d   :  { %v2322_v26 = vmul.f32 %v1112_v35, %v1096_v46 }
0x1b3f   :  { %v1121_v54 = vpack.c.bf16 %v2322_v26, %v2322_v26 }
0x1b41   :  { %1123 = vrot.lane.b32.xlu0 %v1121_v54, %s2026_s17 }
0x1bb3   :  { %v1124_v50 = vpop.permute.xlu0 %1123 }
0x1bb4   :  { %1854 = vmatmul.mubr.msk.bf16.vlgmr.msra.gmra.mrb[28].mxu1 %vm85_vm1, %v1124_v50 }
0x1bb5   :  { %1864 = vmatpush3.bf16.msra.mxu1 %v2239_v1  ;;  %1865 = vmatprep.mubr.msk.bf16.mxu1 %vm2022_vm2, %v2021_v5 }
0x1bb6   :  { %1875 = vmatprep.subr.bf16.mxu1 %v2021_v5 }
0x1c87   :  { %v1162_v57 = vpop.f32.mrb[28].mxu1 }
0x1c88   :  { %v1168_v59 = vadd.f32 %v1162_v57, %v1120_v56  ;;  %v1855_v60 = vpop.f32.mrb[29].mxu1 }
0x1c89   :  { %v1165_v61 = vpop.f32.mrb[30].mxu1 }
0x1c8a   :  { %1961 = vtanh.f32 %v1168_v59  ;;  %v1856_v58 = vpop.f32.mrb[31].mxu1  ;;  %v1169_v62 = vmul.f32 0.5, %v1168_v59  ;;  %v1348_v59 = vld [vmem:[#allocation3 + $0x30] sm:$0xff] }
0x1c8c   :  { %1963 = vtanh.f32 %v1169_v62 }
0x1c94   :  { %v1962_v48 = vpop.eup %1961 }
0x1c95   :  { %1176 = vrot.lane.b32.xlu1 %v1962_v48, %s2024_s15 }
0x1c96   :  { %v1964_v63 = vpop.eup %1963 }
0x1c97   :  { %v1171_v10 = vmul.f32 0.5, %v1964_v63 }
0x1c99   :  { %v1172_v55 = vadd.f32 0.5, %v1171_v10 }
0x1c9b   :  { %v1174_v4 = vmul.f32 %v1172_v55, %v1108_v52 }
0x1d07   :  { %v1177_v0 = vpop.permute.xlu1 %1176 }
0x1d08   :  { %v1179_v2 = vmul.f32 %v1177_v0, %v1172_v55 }
0x1d0a   :  { %1181 = vrot.lane.b32.xlu0 %v1179_v2, %s2025_s16 }
0x1d7c   :  { %v1182_v9 = vpop.permute.xlu0 %1181 }
0x1d7d   :  { %v1184_v11 = vadd.f32 %v1182_v9, %v1174_v4 }
0x1d7f   :  { %1965 = vtanh.f32 %v1184_v11 }
0x1d89   :  { %v1966_v12 = vpop.eup %1965 }
0x1d8a   :  { %1187 = vrot.lane.b32.xlu1 %v1966_v12, %s2025_s16 }
0x1dfc   :  { %v1188_v13 = vpop.permute.xlu1 %1187 }
0x1dfd   :  { %v2335_v7 = vmul.f32 %v1188_v13, %v1172_v55 }
0x1dff   :  { %v1197_v8 = vpack.c.bf16 %v2335_v7, %v2335_v7 }
0x1e01   :  { %1199 = vrot.lane.b32.xlu0 %v1197_v8, %s2026_s17 }
0x1e73   :  { %v1200_v14 = vpop.permute.xlu0 %1199 }
0x1e74   :  { %1860 = vmatmul.mubr.msk.bf16.vlgmr.msra.gmra.mrb[32].mxu0 %vm85_vm1, %v1200_v14 }
0x1e75   :  { %1870 = vmatpush3.bf16.msra.mxu0 %v2239_v1  ;;  %1871 = vmatprep.mubr.msk.bf16.mxu0 %vm2022_vm2, %v2021_v5 }
0x1f47   :  { %v1238_v17 = vpop.f32.mrb[32].mxu0 }
0x1f48   :  { %v1244_v18 = vadd.f32 %v1238_v17, %v1196_v16  ;;  %v1861_v19 = vpop.f32.mrb[33].mxu0 }
0x1f49   :  { %v1241_v20 = vpop.f32.mrb[34].mxu0  ;;  %v1424_v19 = vld [vmem:[#allocation3 + $0x38] sm:$0xff] }
0x1f4a   :  { %1967 = vtanh.f32 %v1244_v18  ;;  %v1862_v30 = vpop.f32.mrb[35].mxu0  ;;  %v1245_v6 = vmul.f32 0.5, %v1244_v18 }
0x1f4c   :  { %1969 = vtanh.f32 %v1245_v6 }
0x1f54   :  { %v1968_v21 = vpop.eup %1967 }
0x1f55   :  { %1252 = vrot.lane.b32.xlu1 %v1968_v21, %s2024_s15 }
0x1f56   :  { %v1970_v22 = vpop.eup %1969 }
0x1f57   :  { %v1247_v23 = vmul.f32 0.5, %v1970_v22 }
0x1f59   :  { %v1248_v24 = vadd.f32 0.5, %v1247_v23 }
0x1f5b   :  { %v1250_v28 = vmul.f32 %v1248_v24, %v1184_v11 }
0x1fc7   :  { %v1253_v25 = vpop.permute.xlu1 %1252 }
0x1fc8   :  { %v1255_v27 = vmul.f32 %v1253_v25, %v1248_v24 }
0x1fca   :  { %1257 = vrot.lane.b32.xlu0 %v1255_v27, %s2025_s16 }
0x203c   :  { %v1258_v29 = vpop.permute.xlu0 %1257 }
0x203d   :  { %v1260_v31 = vadd.f32 %v1258_v29, %v1250_v28 }
0x203f   :  { %1971 = vtanh.f32 %v1260_v31 }
0x2049   :  { %v1972_v32 = vpop.eup %1971 }
0x204a   :  { %1263 = vrot.lane.b32.xlu1 %v1972_v32, %s2025_s16 }
0x20bc   :  { %v1264_v33 = vpop.permute.xlu1 %1263 }
0x20bd   :  { %v2347_v34 = vmul.f32 %v1264_v33, %v1248_v24 }
0x20bf   :  { %v1273_v36 = vpack.c.bf16 %v2347_v34, %v2347_v34 }
0x20c1   :  { %1275 = vrot.lane.b32.xlu0 %v1273_v36, %s2026_s17 }
0x2133   :  { %v1276_v37 = vpop.permute.xlu0 %1275 }
0x2134   :  { %1866 = vmatmul.mubr.msk.bf16.vlgmr.msra.gmra.mrb[32].mxu1 %vm85_vm1, %v1276_v37 }
0x2135   :  { %1876 = vmatpush3.bf16.msra.mxu1 %v2239_v1  ;;  %1877 = vmatprep.mubr.msk.bf16.mxu1 %vm2022_vm2, %v2021_v5 }
0x2207   :  { %v1314_v39 = vpop.f32.mrb[32].mxu1 }
0x2208   :  { %v1320_v40 = vadd.f32 %v1314_v39, %v1272_v38  ;;  %v1867_v41 = vpop.f32.mrb[33].mxu1 }
0x2209   :  { %v1317_v42 = vpop.f32.mrb[34].mxu1 }
0x220a   :  { %1973 = vtanh.f32 %v1320_v40  ;;  %v1868_v43 = vpop.f32.mrb[35].mxu1  ;;  %v1321_v46 = vmul.f32 0.5, %v1320_v40 }
0x220c   :  { %1975 = vtanh.f32 %v1321_v46  ;;  %v1531_v46 = vstv %s1695_s27  ;;  %s2460_s27 = sld [smem:[#allocation6 + $0x80]] }
0x2214   :  { %v1974_v44 = vpop.eup %1973 }
0x2215   :  { %1328 = vrot.lane.b32.xlu1 %v1974_v44, %s2024_s15  ;;  %v1527_v44 = vstv %s1694_s26  ;;  %s2458_s26 = sld [smem:[#allocation6]] }
0x2216   :  { %v1976_v3 = vpop.eup %1975 }
0x2217   :  { %v1323_v47 = vmul.f32 0.5, %v1976_v3 }
0x2219   :  { %v1324_v49 = vadd.f32 0.5, %v1323_v47  ;;  %v1502_v47 = vstv %s1501_s28  ;;  %s2467_s28 = sld [smem:[#allocation6 + $0x100]] }
0x221b   :  { %v1326_v5 = vmul.f32 %v1324_v49, %v1260_v31 }
0x2287   :  { %v1329_v51 = vpop.permute.xlu1 %1328 }
0x2288   :  { %v1331_v1 = vmul.f32 %v1329_v51, %v1324_v49  ;;  %v1510_v51 = vstv %s1690_s4 }
0x228a   :  { %1333 = vrot.lane.b32.xlu0 %v1331_v1, %s2025_s16  ;;  %v1514_v1 = vstv %s1691_s5 }
0x22fc   :  { %v1334_v52 = vpop.permute.xlu0 %1333 }
0x22fd   :  { %v1336_v53 = vadd.f32 %v1334_v52, %v1326_v5 }
0x22ff   :  { %1977 = vtanh.f32 %v1336_v53 }
0x2309   :  { %v1978_v35 = vpop.eup %1977 }
0x230a   :  { %1339 = vrot.lane.b32.xlu1 %v1978_v35, %s2025_s16 }
0x237c   :  { %v1340_v54 = vpop.permute.xlu1 %1339 }
0x237d   :  { %v2359_v50 = vmul.f32 %v1340_v54, %v1324_v49  ;;  %v1506_v49 = vstv %s1689_s29  ;;  %s2469_s29 = sld [smem:[#allocation6 + $0x180]] }
0x237f   :  { %v1349_v56 = vpack.c.bf16 %v2359_v50, %v2359_v50 }
0x2381   :  { %1351 = vrot.lane.b32.xlu0 %v1349_v56, %s2026_s17  ;;  %v1540_v56 = vstv %s2396_s7 }
0x23f3   :  { %v1352_v57 = vpop.permute.xlu0 %1351 }
0x23f4   :  { %1872 = vmatmul.mubr.msk.bf16.vlgmr.msra.gmra.mrb[36].mxu0 %vm85_vm1, %v1352_v57 }
0x24c7   :  { %v1390_v60 = vpop.f32.mrb[36].mxu0 }
0x24c8   :  { %v1396_v61 = vadd.f32 %v1390_v60, %v1348_v59  ;;  %v1873_v58 = vpop.f32.mrb[37].mxu0 }
0x24c9   :  { %v1393_v48 = vpop.f32.mrb[38].mxu0 }
0x24ca   :  { %1979 = vtanh.f32 %v1396_v61  ;;  %v1874_v62 = vpop.f32.mrb[39].mxu0  ;;  %v1397_v10 = vmul.f32 0.5, %v1396_v61  ;;  %v1544_v48 = vstv %s2398_s8 }
0x24cb   :  { %v1548_v62 = vstv %s2400_s9 }
0x24cc   :  { %1981 = vtanh.f32 %v1397_v10 }
0x24d4   :  { %v1980_v63 = vpop.eup %1979 }
0x24d5   :  { %1404 = vrot.lane.b32.xlu1 %v1980_v63, %s2024_s15 }
0x24d6   :  { %v1982_v55 = vpop.eup %1981 }
0x24d7   :  { %v1399_v0 = vmul.f32 0.5, %v1982_v55 }
0x24d9   :  { %v1400_v2 = vadd.f32 0.5, %v1399_v0 }
0x24db   :  { %v1402_v11 = vmul.f32 %v1400_v2, %v1336_v53 }
0x2547   :  { %v1405_v4 = vpop.permute.xlu1 %1404 }
0x2548   :  { %v1407_v9 = vmul.f32 %v1405_v4, %v1400_v2 }
0x254a   :  { %1409 = vrot.lane.b32.xlu0 %v1407_v9, %s2025_s16  ;;  %v1553_v9 = vstv %s2402_s10 }
0x25bc   :  { %v1410_v12 = vpop.permute.xlu0 %1409 }
0x25bd   :  { %v1412_v13 = vadd.f32 %v1410_v12, %v1402_v11  ;;  %v1557_v11 = vstv %s2404_s11 }
0x25bf   :  { %1983 = vtanh.f32 %v1412_v13 }
0x25c9   :  { %v1984_v8 = vpop.eup %1983 }
0x25ca   :  { %1415 = vrot.lane.b32.xlu1 %v1984_v8, %s2025_s16  ;;  %v1561_v8 = vstv %s2406_s12 }
0x263c   :  { %v1416_v14 = vpop.permute.xlu1 %1415 }
0x263d   :  { %v1418_v16 = vmul.f32 %v1416_v14, %v1400_v2  ;;  %v1565_v14 = vstv %s2408_s13 }
0x263f   :  { %v1425_v17 = vpack.c.bf16 %v1418_v16, %v1418_v16 }
0x2641   :  { %1427 = vrot.lane.b32.xlu0 %v1425_v17, %s2026_s17 }
0x26b3   :  { %v1428_v18 = vpop.permute.xlu0 %1427 }
0x26b4   :  { %1878 = vmatmul.mubr.msk.bf16.vlgmr.msra.gmra.mrb[36].mxu1 %vm85_vm1, %v1428_v18 }
0x2787   :  { %v1466_v20 = vpop.f32.mrb[36].mxu1 }
0x2788   :  { %v1472_v30 = vadd.f32 %v1466_v20, %v1424_v19  ;;  %v1879_v21 = vpop.f32.mrb[37].mxu1 }
0x2789   :  { %v1469_v6 = vpop.f32.mrb[38].mxu1 }
0x278a   :  { %1985 = vtanh.f32 %v1472_v30  ;;  %v1880_v22 = vpop.f32.mrb[39].mxu1  ;;  %v1473_v24 = vmul.f32 0.5, %v1472_v30 }
0x278c   :  { %1987 = vtanh.f32 %v1473_v24 }
0x2794   :  { %v1986_v23 = vpop.eup %1985 }
0x2795   :  { %1480 = vrot.lane.b32.xlu1 %v1986_v23, %s2024_s15  ;;  %s2414_s15 = sld [smem:[#allocation4 + $0x84]]  ;;  %v1570_v23 = vstv %s2412_s14 }
0x2796   :  { %v1988_v25 = vpop.eup %1987 }
0x2797   :  { %v1475_v27 = vmul.f32 0.5, %v1988_v25 }
0x2799   :  { %v1476_v28 = vadd.f32 0.5, %v1475_v27 }
0x279b   :  { %v1478_v32 = vmul.f32 %v1476_v28, %v1412_v13  ;;  %v1574_v24 = vstv %s2414_s15 }
0x2807   :  { %v1481_v29 = vpop.permute.xlu1 %1480 }
0x2808   :  { %v1483_v31 = vmul.f32 %v1481_v29, %v1476_v28  ;;  %v1587_v29 = vstv %s2422_s18 }
0x280a   :  { %1485 = vrot.lane.b32.xlu0 %v1483_v31, %s2025_s16  ;;  %v1591_v31 = vstv %s2424_s19 }
0x280e   :  { %964 = vrot.lane.b32.xlu0 %v2270_v45, %s2026_s17 }
0x2812   :  { %1116 = vrot.lane.b32.xlu0 %v2322_v26, %s2026_s17 }
0x2816   :  { %1268 = vrot.lane.b32.xlu0 %v2347_v34, %s2026_s17 }
0x281a   :  { %1420 = vrot.lane.b32.xlu0 %v1418_v16, %s2026_s17 }
0x287c   :  { %v1486_v33 = vpop.permute.xlu0 %1485 }
0x287d   :  { %v1488_v36 = vadd.f32 %v1486_v33, %v1478_v32  ;;  %v1595_v32 = vstv %s2426_s20  ;;  %v1599_v33 = vstv %s2428_s21 }
0x287f   :  { %1989 = vtanh.f32 %v1488_v36 }
0x2880   :  { %v965_v37 = vpop.permute.xlu0 %964 }
0x2881   :  { %967 = vst.msk [vmem:[#allocation2] sm:$0xff] %vm85_vm1, %v965_v37 }
0x2884   :  { %v1117_v38 = vpop.permute.xlu0 %1116 }
0x2885   :  { %1119 = vst.msk [vmem:[#allocation2 + $0x10] sm:$0xff] %vm85_vm1, %v1117_v38 }
0x2888   :  { %v1269_v39 = vpop.permute.xlu0 %1268  ;;  %v1500_v5 = vld [vmem:[#allocation2] sm:$0xff] }
0x2889   :  { %v1990_v45 = vpop.eup %1989  ;;  %1271 = vst.msk [vmem:[#allocation2 + $0x20] sm:$0xff] %vm85_vm1, %v1269_v39  ;;  %v1503_v57 = vmul.f32 %v1502_v47, %v1500_v5  ;;  %v1507_v59 = vmul.f32 %v1506_v49, %v1500_v5  ;;  %v1511_v60 = vmul.f32 %v1510_v51, %v1500_v5  ;;  %v1515_v61 = vmul.f32 %v1514_v1, %v1500_v5 }
0x288a   :  { %1491 = vrot.lane.b32.xlu1 %v1990_v45, %s2025_s16  ;;  %s2416_s16 = sld [smem:[#allocation4 + $0x104]]  ;;  %v1604_v51 = vstv %s2434_s0  ;;  %v1608_v1 = vstv %s2436_s22  ;;  %v1612_v5 = vstv %s2442_s1 }
0x288c   :  { %v1421_v26 = vpop.permute.xlu0 %1420  ;;  %v1534_v58 = vld [vmem:[#allocation2 + $0x10] sm:$0xff] }
0x288d   :  { %1423 = vst.msk [vmem:[#allocation2 + $0x30] sm:$0xff] %vm85_vm1, %v1421_v26  ;;  %v1541_v4 = vmul.f32 %v1540_v56, %v1534_v58  ;;  %v1545_v12 = vmul.f32 %v1544_v48, %v1534_v58  ;;  %v1549_v13 = vmul.f32 %v1548_v62, %v1534_v58  ;;  %v1625_v48 = vstv %s2452_s24 }
0x288e   :  { %1040 = vrot.lane.b32.xlu1 %v2295_v15, %s2026_s17  ;;  %v1519_v15 = vstv %s1692_s3  ;;  %s2454_s3 = sld [smem:[#allocation4 + $0x107]] }
0x2890   :  { %v1578_v25 = vstv %s2416_s16 }
0x2892   :  { %1192 = vrot.lane.b32.xlu1 %v2335_v7, %s2026_s17  ;;  %v1523_v7 = vstv %s1693_s25  ;;  %s2456_s25 = sld [smem:[#allocation4 + $0x187]] }
0x2894   :  { %v1629_v62 = vstv %s2454_s3 }
0x2896   :  { %1344 = vrot.lane.b32.xlu1 %v2359_v50, %s2026_s17  ;;  %v1536_v50 = vstv %s2394_s30 }
0x2897   :  { %v1537_v2 = vmul.f32 %v1536_v50, %v1534_v58  ;;  %v1621_v58 = vstv %s2450_s2 }
0x28fc   :  { %v1492_v34 = vpop.permute.xlu1 %1491 }
0x28fd   :  { %v1494_v40 = vmul.f32 %v1492_v34, %v1476_v28  ;;  %v1568_v28 = vld [vmem:[#allocation2 + $0x20] sm:$0xff] }
0x28fe   :  { %v1571_v26 = vmul.f32 %v1570_v23, %v1568_v28  ;;  %v1575_v34 = vmul.f32 %v1574_v24, %v1568_v28 }
0x28ff   :  { %1496 = vrot.lane.b32.xlu1 %v1494_v40, %s2026_s17  ;;  %s2418_s17 = sld [smem:[#allocation4 + $0x184]]  ;;  %v1579_v40 = vmul.f32 %v1578_v25, %v1568_v28 }
0x2900   :  { %v1041_v41 = vpop.permute.xlu1 %1040 }
0x2901   :  { %1043 = vst.msk [vmem:[#allocation2 + $0x8] sm:$0xff] %vm85_vm1, %v1041_v41 }
0x2904   :  { %v1193_v42 = vpop.permute.xlu1 %1192 }
0x2905   :  { %1195 = vst.msk [vmem:[#allocation2 + $0x18] sm:$0xff] %vm85_vm1, %v1193_v42  ;;  %v1582_v27 = vstv %s2418_s17 }
0x2906   :  { %v1583_v41 = vmul.f32 %v1582_v27, %v1568_v28 }
0x2908   :  { %v1345_v43 = vpop.permute.xlu1 %1344  ;;  %v1517_v3 = vld [vmem:[#allocation2 + $0x8] sm:$0xff] }
0x2909   :  { %1347 = vst.msk [vmem:[#allocation2 + $0x28] sm:$0xff] %vm85_vm1, %v1345_v43  ;;  %v1520_v52 = vmul.f32 %v1519_v15, %v1517_v3  ;;  %v1524_v53 = vmul.f32 %v1523_v7, %v1517_v3  ;;  %v1528_v35 = vmul.f32 %v1527_v44, %v1517_v3  ;;  %v1532_v54 = vmul.f32 %v1531_v46, %v1517_v3 }
0x290b   :  { %v1521_v63 = vadd.f32 %v1520_v52, %v1503_v57  ;;  %v1525_v10 = vadd.f32 %v1524_v53, %v1507_v59  ;;  %v1529_v55 = vadd.f32 %v1528_v35, %v1511_v60  ;;  %v1533_v0 = vadd.f32 %v1532_v54, %v1515_v61  ;;  %v1602_v53 = vld [vmem:[#allocation2 + $0x30] sm:$0xff] }
0x290c   :  { %v1551_v16 = vld [vmem:[#allocation2 + $0x18] sm:$0xff]  ;;  %v1616_v52 = vstv %s2444_s23  ;;  %v1605_v57 = vmul.f32 %v1604_v51, %v1602_v53  ;;  %v1609_v59 = vmul.f32 %v1608_v1, %v1602_v53  ;;  %v1613_v60 = vmul.f32 %v1612_v5, %v1602_v53 }
0x290d   :  { %v1538_v17 = vadd.f32 %v1537_v2, %v1521_v63  ;;  %v1542_v18 = vadd.f32 %v1541_v4, %v1525_v10  ;;  %v1546_v19 = vadd.f32 %v1545_v12, %v1529_v55  ;;  %v1550_v20 = vadd.f32 %v1549_v13, %v1533_v0 }
0x290e   :  { %v1554_v30 = vmul.f32 %v1553_v9, %v1551_v16  ;;  %v1558_v21 = vmul.f32 %v1557_v11, %v1551_v16  ;;  %v1562_v6 = vmul.f32 %v1561_v8, %v1551_v16  ;;  %v1566_v22 = vmul.f32 %v1565_v14, %v1551_v16 }
0x290f   :  { %v1617_v61 = vmul.f32 %v1616_v52, %v1602_v53  ;;  %v1633_v63 = vstv %s2456_s25  ;;  %v1637_v8 = vstv %s2458_s26  ;;  %v1641_v14 = vstv %s2460_s27 }
0x2910   :  { %v1555_v36 = vadd.f32 %v1554_v30, %v1538_v17  ;;  %v1559_v37 = vadd.f32 %v1558_v21, %v1542_v18  ;;  %v1563_v38 = vadd.f32 %v1562_v6, %v1546_v19  ;;  %v1567_v39 = vadd.f32 %v1566_v22, %v1550_v20  ;;  %v1585_v45 = vld [vmem:[#allocation2 + $0x28] sm:$0xff] }
0x2911   :  { %v1588_v42 = vmul.f32 %v1587_v29, %v1585_v45  ;;  %v1592_v43 = vmul.f32 %v1591_v31, %v1585_v45  ;;  %v1596_v15 = vmul.f32 %v1595_v32, %v1585_v45  ;;  %v1600_v7 = vmul.f32 %v1599_v33, %v1585_v45 }
0x2912   :  { %v1572_v44 = vadd.f32 %v1571_v26, %v1555_v36  ;;  %v1576_v46 = vadd.f32 %v1575_v34, %v1559_v37  ;;  %v1580_v3 = vadd.f32 %v1579_v40, %v1563_v38  ;;  %v1584_v47 = vadd.f32 %v1583_v41, %v1567_v39 }
0x2913   :  { %v1645_v16 = vstv %s2467_s28  ;;  %v1649_v17 = vstv %s2469_s29 }
0x2914   :  { %v1589_v35 = vadd.f32 %v1588_v42, %v1572_v44  ;;  %v1593_v54 = vadd.f32 %v1592_v43, %v1576_v46  ;;  %v1597_v50 = vadd.f32 %v1596_v15, %v1580_v3  ;;  %v1601_v56 = vadd.f32 %v1600_v7, %v1584_v47 }
0x2916   :  { %v1606_v10 = vadd.f32 %v1605_v57, %v1589_v35  ;;  %v1610_v55 = vadd.f32 %v1609_v59, %v1593_v54  ;;  %v1614_v0 = vadd.f32 %v1613_v60, %v1597_v50  ;;  %v1618_v2 = vadd.f32 %v1617_v61, %v1601_v56 }
0x2971   :  { %v1497_v49 = vpop.permute.xlu1 %1496 }
0x2972   :  { %1499 = vst.msk [vmem:[#allocation2 + $0x38] sm:$0xff] %vm85_vm1, %v1497_v49 }
0x2979   :  { %v1619_v4 = vld [vmem:[#allocation2 + $0x38] sm:$0xff] }
0x297a   :  { %v1622_v9 = vmul.f32 %v1621_v58, %v1619_v4  ;;  %v1626_v11 = vmul.f32 %v1625_v48, %v1619_v4  ;;  %v1630_v12 = vmul.f32 %v1629_v62, %v1619_v4  ;;  %v1634_v13 = vmul.f32 %v1633_v63, %v1619_v4 }
0x297c   :  { %v1623_v18 = vadd.f32 %v1622_v9, %v1606_v10  ;;  %v1627_v19 = vadd.f32 %v1626_v11, %v1610_v55  ;;  %v1631_v20 = vadd.f32 %v1630_v12, %v1614_v0  ;;  %v1635_v30 = vadd.f32 %v1634_v13, %v1618_v2 }
0x297e   :  { %v1638_v21 = vadd.f32 %v1637_v8, %v1623_v18  ;;  %v1642_v6 = vadd.f32 %v1641_v14, %v1627_v19  ;;  %v1646_v22 = vadd.f32 %v1645_v16, %v1631_v20  ;;  %v1650_v23 = vadd.f32 %v1649_v17, %v1635_v30 }
0x2980   :  { %1639 = vst.msk [vmem:[%s2501_s6] sm:$0xff] %vm85_vm1, %v1638_v21  ;;  %1643 = vst.msk [vmem:[%s2501_s6 + $0x8] sm:$0xff] %vm85_vm1, %v1642_v6 }
0x2981   :  { %1647 = vst.msk [vmem:[%s2501_s6 + $0x10] sm:$0xff] %vm85_vm1, %v1646_v22  ;;  %1651 = vst.msk [vmem:[%s2501_s6 + $0x18] sm:$0xff] %vm85_vm1, %v1650_v23 }
0x2982   :  { %1656 = vsyncpa [#allocation5], 1 }
0x2983   :  { %1657 = vsyncpa [#allocation7], 1 }

</bundles_post_ra>
